<compile_context>
chip_gen: v7x
topology: tpu7x:2x2x1
jax: 0.10.0
libtpu: 0.0.40
codegen_flags: <defaults>
</compile_context>

<pallas_src>
import functools

import jax
import jax.numpy as jnp
from jax.experimental import pallas as pl
from jax.experimental.pallas import tpu as pltpu

_LANE = 128
_SUBLANE = 8
_F32 = 4  # bytes per float32


def _round_up(x: int, m: int) -> int:
    return ((x + m - 1) // m) * m


def _padded_tile_bytes(rows: int, cols: int, itemsize: int = _F32) -> int:
    # VMEM tiles are laid out in (8 sublane, 128 lane) granules.
    return (_round_up(max(rows, 1), _SUBLANE)
            * _round_up(max(cols, 1), _LANE) * itemsize)


def _vmem_budget_bytes() -> int:
    # Generation-aware cap: ~75% of physical VMEM
    # (~48 MiB on v7x, ~96 MiB on v5e/v6e). Conservative fallback = v7x.
    try:
        cap = int(pltpu.get_tpu_info().vmem_capacity_bytes)
    except Exception:
        cap = 64 * 2**20
    return (cap * 3) // 4


def _linear_predict_kernel(x_ref, w_ref, b_ref, o_ref, *, precision):
    # x: (tile_n, F) f32, w: (F, T) f32, b: (1, T) f32 -> o: (tile_n, T) f32
    acc = jnp.dot(
        x_ref[...],
        w_ref[...],
        preferred_element_type=jnp.float32,
        precision=precision,
    )
    o_ref[...] = (acc + b_ref[...]).astype(o_ref.dtype)


@functools.partial(
    jax.jit, static_argnames=("tile_n", "min_pallas_rows", "precision"))
def torch_regressor_predict(x, coef, intercept, *, tile_n=None,
                            min_pallas_rows: int = 256, precision=None):
    """Pallas equivalent of TorchRegressor(LinearRegression(...)).forward(x).

    x:         (N, F)
    coef:      (T, F) or (F,)   sklearn convention
    intercept: (T,) or scalar
    returns:   (N, T) float32   (or (N,) if coef was 1-D, matching sklearn)
    """
    x = jnp.asarray(x, jnp.float32)
    coef = jnp.asarray(coef, jnp.float32)
    intercept = jnp.atleast_1d(jnp.asarray(intercept, jnp.float32))

    squeeze_out = coef.ndim == 1
    if squeeze_out:
        coef = coef[None, :]

    n, f = x.shape
    t = coef.shape[0]

    # Transpose the (tiny, grid-invariant) weights once in the wrapper so the
    # kernel runs a plain (M,K)@(K,N) MXU dot with no per-step layout work.
    w = coef.T                     # (F, T)
    bias = intercept[None, :]      # (1, T)

    def xla_fallback():
        y = jnp.dot(x, w, precision=precision,
                    preferred_element_type=jnp.float32) + bias
        return y[:, 0] if squeeze_out else y

    # -------- VMEM accounting with (8,128) layout padding -------------------
    vmem_budget = _vmem_budget_bytes()
    usable = vmem_budget - (4 << 20)          # headroom for compiler scratch

    f_lanes = _round_up(f, _LANE)
    t_lanes = _round_up(t, _LANE)
    # Double-buffered x tile + double-buffered out tile, per (padded) row.
    per_row_bytes = _F32 * 2 * (f_lanes + t_lanes)
    # Weights + bias, counted at worst case 2x (double-buffered constants).
    fixed_bytes = 2 * _padded_tile_bytes(f, t) + 2 * _padded_tile_bytes(1, t)

    too_small = n < min_pallas_rows
    too_big = fixed_bytes + 8 * per_row_bytes > usable
    if too_small or too_big:
        # Tiny batches: launch + per-step overhead loses to XLA's fused dot.
        # Huge F*T: weights cannot be VMEM-resident (needs K/T tiling).
        return xla_fallback()

    # -------- Row-tile sizing ------------------------------------------------
    if tile_n is None:
        # Target ~2 MiB of x per tile buffer (amortizes per-step overhead),
        # clamped by the VMEM budget and the problem size.
        target = max(512, (2 << 20) // (_F32 * f_lanes))
        max_rows = (usable - fixed_bytes) // per_row_bytes
        tile_n = min(target, max_rows, _round_up(n, _SUBLANE))
    tile_n = max(_SUBLANE, (int(tile_n) // _SUBLANE) * _SUBLANE)

    # v7x megacore: keep >=2 (>=4) grid steps when there is enough work so
    # both TensorCores get row tiles under dimension_semantics=("parallel",).
    if n >= 2048:
        tile_n = min(tile_n, _round_up(-(-n // 2), _SUBLANE))
    if n >= 8192:
        tile_n = min(tile_n, _round_up(-(-n // 4), _SUBLANE))

    grid = (pl.cdiv(n, tile_n),)

    kernel = functools.partial(_linear_predict_kernel, precision=precision)

    out = pl.pallas_call(
        kernel,
        out_shape=jax.ShapeDtypeStruct((n, t), jnp.float32),
        grid=grid,
        in_specs=[
            pl.BlockSpec((tile_n, f), lambda i: (i, 0)),   # streamed rows of x
            pl.BlockSpec((f, t), lambda i: (0, 0)),        # weights, VMEM-resident
            pl.BlockSpec((1, t), lambda i: (0, 0)),        # bias, VMEM-resident
        ],
        out_specs=pl.BlockSpec((tile_n, t), lambda i: (i, 0)),
        compiler_params=pltpu.CompilerParams(
            dimension_semantics=("parallel",),
            vmem_limit_bytes=int(vmem_budget),
        ),
        cost_estimate=pl.CostEstimate(
            flops=2 * n * f * t + n * t,
            transcendentals=0,
            bytes_accessed=_F32 * (n * f + f * t + t + n * t),
        ),
    )(x, w, bias)

    return out[:, 0] if squeeze_out else out


if __name__ == "__main__":
    key = jax.random.PRNGKey(0)
    kx, kw, kb, kx2 = jax.random.split(key, 4)

    # Tabular shapes: enough rows to hit the tiled Pallas path with >=2 grid
    # steps and a partial (masked) final row tile; still small data overall.
    N, F, T = 3000, 32, 4

    x = jax.random.normal(kx, (N, F), dtype=jnp.float32)
    # Deterministic synthetic "fitted" regressor parameters.
    coef = jax.random.normal(kw, (T, F), dtype=jnp.float32) * 0.1
    intercept = jax.random.normal(kb, (T,), dtype=jnp.float32)

    y = jax.block_until_ready(torch_regressor_predict(x, coef, intercept))
    y_ref = (x @ coef.T + intercept[None, :]).astype(jnp.float32)
    assert y.shape == (N, T) and y.dtype == jnp.float32
    assert jnp.allclose(y, y_ref, atol=5e-3, rtol=5e-3), float(
        jnp.max(jnp.abs(y - y_ref)))

    # Tiny-batch fast path (no Pallas launch) must also match the reference.
    x_small = jax.random.normal(kx2, (8, F), dtype=jnp.float32)
    y_small = jax.block_until_ready(
        torch_regressor_predict(x_small, coef, intercept))
    y_small_ref = (x_small @ coef.T + intercept[None, :]).astype(jnp.float32)
    assert y_small.shape == (8, T)
    assert jnp.allclose(y_small, y_small_ref, atol=5e-3, rtol=5e-3)

    print("KERNEL_OK")
</pallas_src>

<mosaic_0001>
module attributes {stable_mosaic.version = 11 : i64} {
  func.func @_linear_predict_kernel(%arg0: i32, %arg1: memref<1504x32xf32, #tpu.memory_space<vmem>>, %arg2: memref<32x4xf32, #tpu.memory_space<vmem>>, %arg3: memref<1x4xf32, #tpu.memory_space<vmem>>, %arg4: memref<1504x4xf32, #tpu.memory_space<vmem>>) attributes {dimension_semantics = [#tpu.dimension_semantics<parallel>], iteration_bounds = array<i64: 2>, scalar_prefetch = 0 : i64, scratch_operands = 0 : i64, tpu.core_type = #tpu.core_type<tc>, window_params = [{transform_indices = @transform_0, window_bounds = array<i64: 1504, 32>}, {pipeline_mode = #tpu.pipeline_mode<synchronous>, transform_indices = @transform_1, window_bounds = array<i64: 32, 4>}, {pipeline_mode = #tpu.pipeline_mode<synchronous>, transform_indices = @transform_2, window_bounds = array<i64: 1, 4>}, {transform_indices = @transform_3, window_bounds = array<i64: 1504, 4>}]} {
    %c0 = arith.constant 0 : index
    %c0_0 = arith.constant 0 : index
    %0 = vector.load %arg1[%c0, %c0_0] : memref<1504x32xf32, #tpu.memory_space<vmem>>, vector<1504x32xf32>
    %c0_1 = arith.constant 0 : index
    %c0_2 = arith.constant 0 : index
    %1 = vector.load %arg2[%c0_1, %c0_2] : memref<32x4xf32, #tpu.memory_space<vmem>>, vector<32x4xf32>
    %cst = arith.constant dense<0.000000e+00> : vector<1504x4xf32>
    %2 = tpu.matmul %0, %1, %cst {dimension_numbers = #tpu.dot_dimension_numbers<[1], [0], [0], [1], [0, 0, 1, 1], [], []>} : vector<1504x32xf32>, vector<32x4xf32>, vector<1504x4xf32> -> vector<1504x4xf32>
    %c0_3 = arith.constant 0 : index
    %c0_4 = arith.constant 0 : index
    %3 = vector.load %arg3[%c0_3, %c0_4] : memref<1x4xf32, #tpu.memory_space<vmem>>, vector<1x4xf32>
    %4 = vector.broadcast %3 : vector<1x4xf32> to vector<1504x4xf32>
    %5 = arith.addf %2, %4 : vector<1504x4xf32>
    %c0_5 = arith.constant 0 : index
    %c0_6 = arith.constant 0 : index
    %6 = vector.load %arg4[%c0_5, %c0_6] : memref<1504x4xf32, #tpu.memory_space<vmem>>, vector<1504x4xf32>
    tpu.vector_store %arg4[%c0_5, %c0_6], %5 {strides = array<i32>} : memref<1504x4xf32, #tpu.memory_space<vmem>>, vector<1504x4xf32>,
    return
  }
  func.func @transform_0(%arg0: i32) -> (i32, i32) {
    %c0_i32 = arith.constant 0 : i32
    %c0_i32_0 = arith.constant 0 : i32
    return %arg0, %c0_i32 : i32, i32
  }
  func.func @transform_1(%arg0: i32) -> (i32, i32) {
    %c0_i32 = arith.constant 0 : i32
    %c0_i32_0 = arith.constant 0 : i32
    %c0_i32_1 = arith.constant 0 : i32
    return %c0_i32, %c0_i32_0 : i32, i32
  }
  func.func @transform_2(%arg0: i32) -> (i32, i32) {
    %c0_i32 = arith.constant 0 : i32
    %c0_i32_0 = arith.constant 0 : i32
    %c0_i32_1 = arith.constant 0 : i32
    return %c0_i32, %c0_i32_0 : i32, i32
  }
  func.func @transform_3(%arg0: i32) -> (i32, i32) {
    %c0_i32 = arith.constant 0 : i32
    %c0_i32_0 = arith.constant 0 : i32
    return %arg0, %c0_i32 : i32, i32
  }
}

</mosaic_0001>

<bundles_post_ra>
// kernel: torch_regressor_predict.1
= control target key start
LH: loop header
LB: loop body
LE: loop exit
PB: predicated region body
PF: predicated region fallthrough
CT: control target
= control target key end

     0   :  { %s3521_s12 = smov 0   ;;  %s3523_s13 = smov 0   ;;  %s4711_s0 = inlined_call_operand.vmem [shape: f32[3000,32], index: 0, kind: input, shape index: {}]   ;;  %s4712_s1 = inlined_call_operand.vmem [shape: f32[32,4], index: 1, kind: input, shape index: {}]   ;;  %s4713_s2 = inlined_call_operand.vmem [shape: f32[1,4], index: 2, kind: input, shape index: {}]   ;;  %s4714_s3 = inlined_call_operand.vmem [shape: f32[3000,4], index: 3, kind: output, shape index: {}]  }
   0x1   :  { %s3525_s14 = smov 0  }
   0x2 LB: > { %s3534_s15 = sadd.s32 4294967295, %s3467_s14   ;;  %s3536_s16 = sadd.s32 1, %s3467_s14   ;;  %s3467_s14 = sphi %s3525_s14, %s4723_s14   ;;  %s3463_s13 = sphi %s3523_s13, %s4722_s13   ;;  %s3459_s12 = sphi %s3521_s12, %s4721_s12  }
   0x3   : > { %s85_s17 = ssub.s32 %s3467_s14, %s3536_s16  ;;  %s88_s18 = sadd.s32 1, %s3463_s13 }
   0x4   : > { %p86_p0 = scmp.eq.s32.totalorder %s85_s17, 0  ;;  %p98_p1 = scmp.ne.s32.totalorder %s3463_s13, %s3459_s12 }
   0x5   : > { %p99_p2 = scmp.eq.s32.totalorder %s3534_s15, 1  ;;  %p2620_p3 = scmp.ge.s32.totalorder %s3467_s14, 1 }
   0x6   : > { %s3544_s19 = scalar_select %p86_p0, %s3463_s13, %s88_s18  }
   0x7   : > { %p3546_p4 = por %p99_p2, %p98_p1  ;;  %p146_p5 = scmp.lt.s32.totalorder %s3467_s14, 3 }
   0x9   : > { %p147_p6 = pnand %p2620_p3, %p146_p5 }
   0xa   : > { %v380_v0 = vld [vmem:[%s4712_s1] sm:$0xff] (!%p147_p6)  ;;  %v381_v1 = vld [vmem:[%s4712_s1 + $0x8] sm:$0xff] (!%p147_p6)  ;;  %v382_v2 = vld [vmem:[%s4712_s1 + $0x10] sm:$0xff] (!%p147_p6)  ;;  %s3560_s27 = smul.u32 (!%p147_p6), 188, %s3534_s15  ;;  %vm391_vm0 = vcmask (!%p147_p6), 261120   ;;  %s170_s8 = sand.u32 (!%p147_p6), 1, %s3459_s12  }
   0xb   : > { %150 = sbr.rel (%p147_p6) target bundleno = 496 (0x1f0), region = 32  ;;  %v3311_v3 = vpack.c.bf16 (!%p147_p6), %v381_v1, %v380_v0  ;;  %v383_v4 = vld [vmem:[%s4712_s1 + $0x18] sm:$0xff] (!%p147_p6)  ;;  %vm1961_vm1 = vcmask (!%p147_p6), 31744  }
   0xc   : > { %v3315_v5 = vpack.c.bf16 (!%p147_p6), %v383_v4, %v382_v2  ;;  %p178_p7 = scmp.lt.s32.totalorder (!%p147_p6), %s3560_s27, 374  ;;  %s3323_s9 = smul.u32 (!%p147_p6), 1504, %s170_s8 }
   0xd   : > { %3312 = vmatprep.subr.bf16.mxu0 (!%p147_p6), %v3311_v3  ;;  %3319 = vmatprep.subr.bf16.mxu1 (!%p147_p6), %v3311_v3 }
   0xe   : > { %3314 = vmatpush3.bf16.msra.mxu0 (!%p147_p6), %v3311_v3  ;;  %3321 = vmatpush3.bf16.msra.mxu1 (!%p147_p6), %v3311_v3  ;;  %s3958_s12 = scalar_lea.vmem (!%p147_p6), [#allocation2], %s3323_s9  }
   0xf   : > { %3316 = vmatprep.subr.bf16.mxu0 (!%p147_p6), %v3315_v5  ;;  %3320 = vmatprep.subr.bf16.mxu1 (!%p147_p6), %v3315_v5 }
  0x12   : > { %s179_s30 = scalar_select %p178_p7, %s3560_s27, 374  ;;  %3318 = vmatpush3.bf16.msra.mxu0 %v3315_v5  ;;  %3322 = vmatpush3.bf16.msra.mxu1 %v3315_v5 }
  0x13   : > { %s2158_s18 = ssub.s32 (%p3546_p4), 375, %s3560_s27  ;;  %s2826_s21 = smul.u32 (%p3546_p4), 1504, %s3534_s15 }
  0x14   : > { %s2621_s4 = sshll.u32 %s179_s30, 3  ;;  %p2159_p8 = scmp.lt.s32.totalorder (%p3546_p4), %s2158_s18, 188 }
  0x15   : > { %s3570_s7 = scalar_lea.vmem %s4711_s0, %s2621_s4  ;;  %s4512_s24 = scalar_lea.vmem (%p3546_p4), %s4714_s3, %s2826_s21  }
  0x16   : > { %v192_v6 = vld [vmem:[%s3570_s7] sm:$0xff]  ;;  %v286_v7 = vld [vmem:[%s3570_s7 + $0x2f0] sm:$0xff]  ;;  %v193_v8 = vld [vmem:[%s3570_s7 + $0x8] sm:$0xff] }
  0x17   : > { %3029 = vmatprep.mubr.msk.f32.mxu0 %vm391_vm0, %v192_v6  ;;  %3170 = vmatprep.mubr.msk.f32.mxu1 %vm391_vm0, %v286_v7  ;;  %v287_v9 = vld [vmem:[%s3570_s7 + $0x2f8] sm:$0xff]  ;;  %v194_v10 = vld [vmem:[%s3570_s7 + $0x10] sm:$0xff]  ;;  %v288_v11 = vld [vmem:[%s3570_s7 + $0x300] sm:$0xff] }
  0x18   : > { %3030 = vmatmul.mubr.msk.f32.vlgmr.msra.gmra.mrb[0].mxu0 %vm391_vm0, %v193_v8  ;;  %3171 = vmatmul.mubr.msk.f32.vlgmr.msra.gmra.mrb[0].mxu1 %vm391_vm0, %v287_v9  ;;  %v195_v12 = vld [vmem:[%s3570_s7 + $0x18] sm:$0xff]  ;;  %v289_v13 = vld [vmem:[%s3570_s7 + $0x308] sm:$0xff]  ;;  %v196_v14 = vld [vmem:[%s3570_s7 + $0x20] sm:$0xff] }
  0x19   : > { %3032 = vmatprep.mubr.msk.f32.mxu0 %vm391_vm0, %v194_v10  ;;  %3173 = vmatprep.mubr.msk.f32.mxu1 %vm391_vm0, %v288_v11  ;;  %v290_v15 = vld [vmem:[%s3570_s7 + $0x310] sm:$0xff]  ;;  %v197_v16 = vld [vmem:[%s3570_s7 + $0x28] sm:$0xff]  ;;  %v291_v17 = vld [vmem:[%s3570_s7 + $0x318] sm:$0xff] }
  0x1a   : > { %v198_v18 = vld [vmem:[%s3570_s7 + $0x30] sm:$0xff]  ;;  %v292_v19 = vld [vmem:[%s3570_s7 + $0x320] sm:$0xff]  ;;  %v199_v20 = vld [vmem:[%s3570_s7 + $0x38] sm:$0xff] }
  0x1b   : > { %v293_v21 = vld [vmem:[%s3570_s7 + $0x328] sm:$0xff]  ;;  %v200_v22 = vld [vmem:[%s3570_s7 + $0x40] sm:$0xff]  ;;  %v294_v23 = vld [vmem:[%s3570_s7 + $0x330] sm:$0xff] }
  0x1c   : > { %3033 = vmatmul.mubr.msk.f32.gmra.mrb[2].mxu0 %vm391_vm0, %v195_v12  ;;  %3174 = vmatmul.mubr.msk.f32.gmra.mrb[2].mxu1 %vm391_vm0, %v289_v13  ;;  %v201_v24 = vld [vmem:[%s3570_s7 + $0x48] sm:$0xff]  ;;  %v295_v25 = vld [vmem:[%s3570_s7 + $0x338] sm:$0xff]  ;;  %v202_v26 = vld [vmem:[%s3570_s7 + $0x50] sm:$0xff] }
  0x1d   : > { %3035 = vmatprep.mubr.msk.f32.mxu0 %vm391_vm0, %v196_v14  ;;  %3176 = vmatprep.mubr.msk.f32.mxu1 %vm391_vm0, %v290_v15  ;;  %v296_v27 = vld [vmem:[%s3570_s7 + $0x340] sm:$0xff]  ;;  %v203_v28 = vld [vmem:[%s3570_s7 + $0x58] sm:$0xff]  ;;  %v297_v29 = vld [vmem:[%s3570_s7 + $0x348] sm:$0xff] }
  0x1e   : > { %v204_v30 = vld [vmem:[%s3570_s7 + $0x60] sm:$0xff]  ;;  %v298_v31 = vld [vmem:[%s3570_s7 + $0x350] sm:$0xff]  ;;  %v205_v32 = vld [vmem:[%s3570_s7 + $0x68] sm:$0xff] }
  0x1f   : > { %v299_v33 = vld [vmem:[%s3570_s7 + $0x358] sm:$0xff]  ;;  %v206_v34 = vld [vmem:[%s3570_s7 + $0x70] sm:$0xff]  ;;  %v300_v35 = vld [vmem:[%s3570_s7 + $0x360] sm:$0xff] }
  0x20   : > { %3036 = vmatmul.mubr.msk.f32.gmra.mrb[4].mxu0 %vm391_vm0, %v197_v16  ;;  %3177 = vmatmul.mubr.msk.f32.gmra.mrb[4].mxu1 %vm391_vm0, %v291_v17  ;;  %v207_v36 = vld [vmem:[%s3570_s7 + $0x78] sm:$0xff]  ;;  %v301_v37 = vld [vmem:[%s3570_s7 + $0x368] sm:$0xff]  ;;  %v208_v38 = vld [vmem:[%s3570_s7 + $0x80] sm:$0xff] }
  0x21   : > { %3038 = vmatprep.mubr.msk.f32.mxu0 %vm391_vm0, %v198_v18  ;;  %3179 = vmatprep.mubr.msk.f32.mxu1 %vm391_vm0, %v292_v19  ;;  %v302_v39 = vld [vmem:[%s3570_s7 + $0x370] sm:$0xff]  ;;  %v209_v40 = vld [vmem:[%s3570_s7 + $0x88] sm:$0xff]  ;;  %v303_v41 = vld [vmem:[%s3570_s7 + $0x378] sm:$0xff] }
  0x22   : > { %v210_v42 = vld [vmem:[%s3570_s7 + $0x90] sm:$0xff]  ;;  %v304_v43 = vld [vmem:[%s3570_s7 + $0x380] sm:$0xff]  ;;  %v211_v44 = vld [vmem:[%s3570_s7 + $0x98] sm:$0xff] }
  0x23   : > { %v305_v45 = vld [vmem:[%s3570_s7 + $0x388] sm:$0xff]  ;;  %v212_v46 = vld [vmem:[%s3570_s7 + $0xa0] sm:$0xff]  ;;  %v306_v47 = vld [vmem:[%s3570_s7 + $0x390] sm:$0xff] }
  0x24   : > { %3039 = vmatmul.mubr.msk.f32.gmra.mrb[6].mxu0 %vm391_vm0, %v199_v20  ;;  %3180 = vmatmul.mubr.msk.f32.gmra.mrb[6].mxu1 %vm391_vm0, %v293_v21  ;;  %v213_v48 = vld [vmem:[%s3570_s7 + $0xa8] sm:$0xff]  ;;  %v307_v49 = vld [vmem:[%s3570_s7 + $0x398] sm:$0xff]  ;;  %v214_v50 = vld [vmem:[%s3570_s7 + $0xb0] sm:$0xff] }
  0x25   : > { %3041 = vmatprep.mubr.msk.f32.mxu0 %vm391_vm0, %v200_v22  ;;  %3182 = vmatprep.mubr.msk.f32.mxu1 %vm391_vm0, %v294_v23  ;;  %v308_v51 = vld [vmem:[%s3570_s7 + $0x3a0] sm:$0xff]  ;;  %v215_v52 = vld [vmem:[%s3570_s7 + $0xb8] sm:$0xff]  ;;  %v309_v53 = vld [vmem:[%s3570_s7 + $0x3a8] sm:$0xff] }
  0x26   : > { %v216_v54 = vld [vmem:[%s3570_s7 + $0xc0] sm:$0xff]  ;;  %v310_v55 = vld [vmem:[%s3570_s7 + $0x3b0] sm:$0xff]  ;;  %v217_v56 = vld [vmem:[%s3570_s7 + $0xc8] sm:$0xff] }
  0x27   : > { %v311_v57 = vld [vmem:[%s3570_s7 + $0x3b8] sm:$0xff]  ;;  %v218_v58 = vld [vmem:[%s3570_s7 + $0xd0] sm:$0xff]  ;;  %v312_v59 = vld [vmem:[%s3570_s7 + $0x3c0] sm:$0xff] }
  0x28   : > { %3042 = vmatmul.mubr.msk.f32.gmra.mrb[8].mxu0 %vm391_vm0, %v201_v24  ;;  %3183 = vmatmul.mubr.msk.f32.gmra.mrb[8].mxu1 %vm391_vm0, %v295_v25  ;;  %v219_v60 = vld [vmem:[%s3570_s7 + $0xd8] sm:$0xff]  ;;  %v313_v61 = vld [vmem:[%s3570_s7 + $0x3c8] sm:$0xff]  ;;  %v220_v62 = vld [vmem:[%s3570_s7 + $0xe0] sm:$0xff] }
  0x29   : > { %3044 = vmatprep.mubr.msk.f32.mxu0 %vm391_vm0, %v202_v26  ;;  %3185 = vmatprep.mubr.msk.f32.mxu1 %vm391_vm0, %v296_v27  ;;  %v314_v63 = vld [vmem:[%s3570_s7 + $0x3d0] sm:$0xff]  ;;  %v221_v0 = vld [vmem:[%s3570_s7 + $0xe8] sm:$0xff]  ;;  %v315_v1 = vld [vmem:[%s3570_s7 + $0x3d8] sm:$0xff] }
  0x2a   : > { %v222_v2 = vld [vmem:[%s3570_s7 + $0xf0] sm:$0xff]  ;;  %v316_v3 = vld [vmem:[%s3570_s7 + $0x3e0] sm:$0xff]  ;;  %v223_v4 = vld [vmem:[%s3570_s7 + $0xf8] sm:$0xff] }
  0x2b   : > { %v317_v5 = vld [vmem:[%s3570_s7 + $0x3e8] sm:$0xff]  ;;  %v224_v6 = vld [vmem:[%s3570_s7 + $0x100] sm:$0xff]  ;;  %v318_v7 = vld [vmem:[%s3570_s7 + $0x3f0] sm:$0xff] }
  0x2c   : > { %3045 = vmatmul.mubr.msk.f32.gmra.mrb[10].mxu0 %vm391_vm0, %v203_v28  ;;  %3186 = vmatmul.mubr.msk.f32.gmra.mrb[10].mxu1 %vm391_vm0, %v297_v29  ;;  %v225_v8 = vld [vmem:[%s3570_s7 + $0x108] sm:$0xff]  ;;  %v319_v9 = vld [vmem:[%s3570_s7 + $0x3f8] sm:$0xff]  ;;  %v226_v10 = vld [vmem:[%s3570_s7 + $0x110] sm:$0xff] }
  0x2d   : > { %3047 = vmatprep.mubr.msk.f32.mxu0 %vm391_vm0, %v204_v30  ;;  %3188 = vmatprep.mubr.msk.f32.mxu1 %vm391_vm0, %v298_v31  ;;  %v320_v11 = vld [vmem:[%s3570_s7 + $0x400] sm:$0xff]  ;;  %v227_v12 = vld [vmem:[%s3570_s7 + $0x118] sm:$0xff]  ;;  %v321_v13 = vld [vmem:[%s3570_s7 + $0x408] sm:$0xff] }
  0x2e   : > { %v228_v14 = vld [vmem:[%s3570_s7 + $0x120] sm:$0xff]  ;;  %v322_v15 = vld [vmem:[%s3570_s7 + $0x410] sm:$0xff]  ;;  %v229_v16 = vld [vmem:[%s3570_s7 + $0x128] sm:$0xff] }
  0x2f   : > { %v323_v17 = vld [vmem:[%s3570_s7 + $0x418] sm:$0xff]  ;;  %v230_v18 = vld [vmem:[%s3570_s7 + $0x130] sm:$0xff]  ;;  %v324_v19 = vld [vmem:[%s3570_s7 + $0x420] sm:$0xff] }
  0x30   : > { %3048 = vmatmul.mubr.msk.f32.gmra.mrb[12].mxu0 %vm391_vm0, %v205_v32  ;;  %3189 = vmatmul.mubr.msk.f32.gmra.mrb[12].mxu1 %vm391_vm0, %v299_v33  ;;  %v231_v20 = vld [vmem:[%s3570_s7 + $0x138] sm:$0xff]  ;;  %v325_v21 = vld [vmem:[%s3570_s7 + $0x428] sm:$0xff]  ;;  %v232_v22 = vld [vmem:[%s3570_s7 + $0x140] sm:$0xff] }
  0x31   : > { %3050 = vmatprep.mubr.msk.f32.mxu0 %vm391_vm0, %v206_v34  ;;  %3191 = vmatprep.mubr.msk.f32.mxu1 %vm391_vm0, %v300_v35  ;;  %v326_v23 = vld [vmem:[%s3570_s7 + $0x430] sm:$0xff]  ;;  %v233_v24 = vld [vmem:[%s3570_s7 + $0x148] sm:$0xff]  ;;  %v327_v25 = vld [vmem:[%s3570_s7 + $0x438] sm:$0xff] }
  0x32   : > { %v234_v26 = vld [vmem:[%s3570_s7 + $0x150] sm:$0xff]  ;;  %v328_v27 = vld [vmem:[%s3570_s7 + $0x440] sm:$0xff]  ;;  %v235_v28 = vld [vmem:[%s3570_s7 + $0x158] sm:$0xff] }
  0x33   : > { %v329_v29 = vld [vmem:[%s3570_s7 + $0x448] sm:$0xff]  ;;  %v236_v30 = vld [vmem:[%s3570_s7 + $0x160] sm:$0xff]  ;;  %v330_v31 = vld [vmem:[%s3570_s7 + $0x450] sm:$0xff] }
  0x34   : > { %3051 = vmatmul.mubr.msk.f32.gmra.mrb[14].mxu0 %vm391_vm0, %v207_v36  ;;  %3192 = vmatmul.mubr.msk.f32.gmra.mrb[14].mxu1 %vm391_vm0, %v301_v37  ;;  %v237_v32 = vld [vmem:[%s3570_s7 + $0x168] sm:$0xff]  ;;  %v331_v33 = vld [vmem:[%s3570_s7 + $0x458] sm:$0xff]  ;;  %v238_v34 = vld [vmem:[%s3570_s7 + $0x170] sm:$0xff] }
  0x35   : > { %3053 = vmatprep.mubr.msk.f32.mxu0 %vm391_vm0, %v208_v38  ;;  %3194 = vmatprep.mubr.msk.f32.mxu1 %vm391_vm0, %v302_v39  ;;  %v332_v35 = vld [vmem:[%s3570_s7 + $0x460] sm:$0xff]  ;;  %v239_v36 = vld [vmem:[%s3570_s7 + $0x178] sm:$0xff]  ;;  %v333_v37 = vld [vmem:[%s3570_s7 + $0x468] sm:$0xff] }
  0x36   : > { %v240_v38 = vld [vmem:[%s3570_s7 + $0x180] sm:$0xff]  ;;  %v334_v39 = vld [vmem:[%s3570_s7 + $0x470] sm:$0xff] }
  0x38   : > { %3054 = vmatmul.mubr.msk.f32.gmra.mrb[16].mxu0 %vm391_vm0, %v209_v40  ;;  %3195 = vmatmul.mubr.msk.f32.gmra.mrb[16].mxu1 %vm391_vm0, %v303_v41  ;;  %v241_v40 = vld [vmem:[%s3570_s7 + $0x188] sm:$0xff]  ;;  %v335_v41 = vld [vmem:[%s3570_s7 + $0x478] sm:$0xff] }
  0x39   : > { %3056 = vmatprep.mubr.msk.f32.mxu0 %vm391_vm0, %v210_v42  ;;  %3197 = vmatprep.mubr.msk.f32.mxu1 %vm391_vm0, %v304_v43  ;;  %v242_v42 = vld [vmem:[%s3570_s7 + $0x190] sm:$0xff]  ;;  %v336_v43 = vld [vmem:[%s3570_s7 + $0x480] sm:$0xff] }
  0x3c   : > { %3057 = vmatmul.mubr.msk.f32.gmra.mrb[18].mxu0 %vm391_vm0, %v211_v44  ;;  %3198 = vmatmul.mubr.msk.f32.gmra.mrb[18].mxu1 %vm391_vm0, %v305_v45  ;;  %v243_v44 = vld [vmem:[%s3570_s7 + $0x198] sm:$0xff]  ;;  %v337_v45 = vld [vmem:[%s3570_s7 + $0x488] sm:$0xff] }
  0x3d   : > { %3059 = vmatprep.mubr.msk.f32.mxu0 %vm391_vm0, %v212_v46  ;;  %3200 = vmatprep.mubr.msk.f32.mxu1 %vm391_vm0, %v306_v47  ;;  %v244_v46 = vld [vmem:[%s3570_s7 + $0x1a0] sm:$0xff]  ;;  %v338_v47 = vld [vmem:[%s3570_s7 + $0x490] sm:$0xff] }
  0x40   : > { %3060 = vmatmul.mubr.msk.f32.gmra.mrb[20].mxu0 %vm391_vm0, %v213_v48  ;;  %3201 = vmatmul.mubr.msk.f32.gmra.mrb[20].mxu1 %vm391_vm0, %v307_v49  ;;  %v245_v48 = vld [vmem:[%s3570_s7 + $0x1a8] sm:$0xff]  ;;  %v339_v49 = vld [vmem:[%s3570_s7 + $0x498] sm:$0xff] }
  0x41   : > { %3062 = vmatprep.mubr.msk.f32.mxu0 %vm391_vm0, %v214_v50  ;;  %3203 = vmatprep.mubr.msk.f32.mxu1 %vm391_vm0, %v308_v51  ;;  %v246_v50 = vld [vmem:[%s3570_s7 + $0x1b0] sm:$0xff]  ;;  %v340_v51 = vld [vmem:[%s3570_s7 + $0x4a0] sm:$0xff] }
  0x44   : > { %3063 = vmatmul.mubr.msk.f32.gmra.mrb[22].mxu0 %vm391_vm0, %v215_v52  ;;  %3204 = vmatmul.mubr.msk.f32.gmra.mrb[22].mxu1 %vm391_vm0, %v309_v53  ;;  %v247_v52 = vld [vmem:[%s3570_s7 + $0x1b8] sm:$0xff]  ;;  %v341_v53 = vld [vmem:[%s3570_s7 + $0x4a8] sm:$0xff] }
  0x45   : > { %3065 = vmatprep.mubr.msk.f32.mxu0 %vm391_vm0, %v216_v54  ;;  %3206 = vmatprep.mubr.msk.f32.mxu1 %vm391_vm0, %v310_v55  ;;  %v248_v54 = vld [vmem:[%s3570_s7 + $0x1c0] sm:$0xff]  ;;  %v342_v55 = vld [vmem:[%s3570_s7 + $0x4b0] sm:$0xff] }
  0x48   : > { %3066 = vmatmul.mubr.msk.f32.gmra.mrb[24].mxu0 %vm391_vm0, %v217_v56  ;;  %3207 = vmatmul.mubr.msk.f32.gmra.mrb[24].mxu1 %vm391_vm0, %v311_v57  ;;  %v249_v56 = vld [vmem:[%s3570_s7 + $0x1c8] sm:$0xff]  ;;  %v343_v57 = vld [vmem:[%s3570_s7 + $0x4b8] sm:$0xff] }
  0x49   : > { %3068 = vmatprep.mubr.msk.f32.mxu0 %vm391_vm0, %v218_v58  ;;  %3209 = vmatprep.mubr.msk.f32.mxu1 %vm391_vm0, %v312_v59  ;;  %v250_v58 = vld [vmem:[%s3570_s7 + $0x1d0] sm:$0xff]  ;;  %v344_v59 = vld [vmem:[%s3570_s7 + $0x4c0] sm:$0xff] }
  0x4c   : > { %3069 = vmatmul.mubr.msk.f32.gmra.mrb[26].mxu0 %vm391_vm0, %v219_v60  ;;  %3210 = vmatmul.mubr.msk.f32.gmra.mrb[26].mxu1 %vm391_vm0, %v313_v61  ;;  %v251_v60 = vld [vmem:[%s3570_s7 + $0x1d8] sm:$0xff]  ;;  %v345_v61 = vld [vmem:[%s3570_s7 + $0x4c8] sm:$0xff] }
  0x4d   : > { %3071 = vmatprep.mubr.msk.f32.mxu0 %vm391_vm0, %v220_v62  ;;  %3212 = vmatprep.mubr.msk.f32.mxu1 %vm391_vm0, %v314_v63  ;;  %v252_v62 = vld [vmem:[%s3570_s7 + $0x1e0] sm:$0xff]  ;;  %v346_v63 = vld [vmem:[%s3570_s7 + $0x4d0] sm:$0xff] }
  0x50   : > { %3072 = vmatmul.mubr.msk.f32.gmra.mrb[28].mxu0 %vm391_vm0, %v221_v0  ;;  %3213 = vmatmul.mubr.msk.f32.gmra.mrb[28].mxu1 %vm391_vm0, %v315_v1  ;;  %v253_v0 = vld [vmem:[%s3570_s7 + $0x1e8] sm:$0xff]  ;;  %v347_v1 = vld [vmem:[%s3570_s7 + $0x4d8] sm:$0xff] }
  0x51   : > { %3074 = vmatprep.mubr.msk.f32.mxu0 %vm391_vm0, %v222_v2  ;;  %3215 = vmatprep.mubr.msk.f32.mxu1 %vm391_vm0, %v316_v3  ;;  %v254_v2 = vld [vmem:[%s3570_s7 + $0x1f0] sm:$0xff]  ;;  %v348_v3 = vld [vmem:[%s3570_s7 + $0x4e0] sm:$0xff] }
  0x54   : > { %3075 = vmatmul.mubr.msk.f32.gmra.mrb[30].mxu0 %vm391_vm0, %v223_v4  ;;  %3216 = vmatmul.mubr.msk.f32.gmra.mrb[30].mxu1 %vm391_vm0, %v317_v5  ;;  %v255_v4 = vld [vmem:[%s3570_s7 + $0x1f8] sm:$0xff]  ;;  %v349_v5 = vld [vmem:[%s3570_s7 + $0x4e8] sm:$0xff] }
  0x55   : > { %3077 = vmatprep.mubr.msk.f32.mxu0 %vm391_vm0, %v224_v6  ;;  %3218 = vmatprep.mubr.msk.f32.mxu1 %vm391_vm0, %v318_v7  ;;  %v256_v6 = vld [vmem:[%s3570_s7 + $0x200] sm:$0xff]  ;;  %v350_v7 = vld [vmem:[%s3570_s7 + $0x4f0] sm:$0xff] }
  0x58   : > { %3078 = vmatmul.mubr.msk.f32.gmra.mrb[32].mxu0 %vm391_vm0, %v225_v8  ;;  %3219 = vmatmul.mubr.msk.f32.gmra.mrb[32].mxu1 %vm391_vm0, %v319_v9  ;;  %v257_v8 = vld [vmem:[%s3570_s7 + $0x208] sm:$0xff]  ;;  %v351_v9 = vld [vmem:[%s3570_s7 + $0x4f8] sm:$0xff] }
  0x59   : > { %3080 = vmatprep.mubr.msk.f32.mxu0 %vm391_vm0, %v226_v10  ;;  %3221 = vmatprep.mubr.msk.f32.mxu1 %vm391_vm0, %v320_v11  ;;  %v258_v10 = vld [vmem:[%s3570_s7 + $0x210] sm:$0xff]  ;;  %v352_v11 = vld [vmem:[%s3570_s7 + $0x500] sm:$0xff] }
  0x5c   : > { %3081 = vmatmul.mubr.msk.f32.gmra.mrb[34].mxu0 %vm391_vm0, %v227_v12  ;;  %3222 = vmatmul.mubr.msk.f32.gmra.mrb[34].mxu1 %vm391_vm0, %v321_v13  ;;  %v259_v12 = vld [vmem:[%s3570_s7 + $0x218] sm:$0xff]  ;;  %v353_v13 = vld [vmem:[%s3570_s7 + $0x508] sm:$0xff] }
  0x5d   : > { %3083 = vmatprep.mubr.msk.f32.mxu0 %vm391_vm0, %v228_v14  ;;  %3224 = vmatprep.mubr.msk.f32.mxu1 %vm391_vm0, %v322_v15  ;;  %v260_v14 = vld [vmem:[%s3570_s7 + $0x220] sm:$0xff]  ;;  %v354_v15 = vld [vmem:[%s3570_s7 + $0x510] sm:$0xff] }
  0x60   : > { %3084 = vmatmul.mubr.msk.f32.gmra.mrb[36].mxu0 %vm391_vm0, %v229_v16  ;;  %3225 = vmatmul.mubr.msk.f32.gmra.mrb[36].mxu1 %vm391_vm0, %v323_v17  ;;  %v261_v16 = vld [vmem:[%s3570_s7 + $0x228] sm:$0xff]  ;;  %v355_v17 = vld [vmem:[%s3570_s7 + $0x518] sm:$0xff] }
  0x61   : > { %3086 = vmatprep.mubr.msk.f32.mxu0 %vm391_vm0, %v230_v18  ;;  %3227 = vmatprep.mubr.msk.f32.mxu1 %vm391_vm0, %v324_v19  ;;  %v262_v18 = vld [vmem:[%s3570_s7 + $0x230] sm:$0xff]  ;;  %v356_v19 = vld [vmem:[%s3570_s7 + $0x520] sm:$0xff] }
  0x64   : > { %3087 = vmatmul.mubr.msk.f32.gmra.mrb[38].mxu0 %vm391_vm0, %v231_v20  ;;  %3228 = vmatmul.mubr.msk.f32.gmra.mrb[38].mxu1 %vm391_vm0, %v325_v21  ;;  %v263_v20 = vld [vmem:[%s3570_s7 + $0x238] sm:$0xff]  ;;  %v357_v21 = vld [vmem:[%s3570_s7 + $0x528] sm:$0xff] }
  0x65   : > { %3089 = vmatprep.mubr.msk.f32.mxu0 %vm391_vm0, %v232_v22  ;;  %3230 = vmatprep.mubr.msk.f32.mxu1 %vm391_vm0, %v326_v23  ;;  %v264_v22 = vld [vmem:[%s3570_s7 + $0x240] sm:$0xff]  ;;  %v358_v23 = vld [vmem:[%s3570_s7 + $0x530] sm:$0xff] }
  0x68   : > { %3090 = vmatmul.mubr.msk.f32.gmra.mrb[40].mxu0 %vm391_vm0, %v233_v24  ;;  %3231 = vmatmul.mubr.msk.f32.gmra.mrb[40].mxu1 %vm391_vm0, %v327_v25  ;;  %v265_v24 = vld [vmem:[%s3570_s7 + $0x248] sm:$0xff]  ;;  %v359_v25 = vld [vmem:[%s3570_s7 + $0x538] sm:$0xff] }
  0x69   : > { %3092 = vmatprep.mubr.msk.f32.mxu0 %vm391_vm0, %v234_v26  ;;  %3233 = vmatprep.mubr.msk.f32.mxu1 %vm391_vm0, %v328_v27  ;;  %v266_v26 = vld [vmem:[%s3570_s7 + $0x250] sm:$0xff]  ;;  %v360_v27 = vld [vmem:[%s3570_s7 + $0x540] sm:$0xff] }
  0x6c   : > { %3093 = vmatmul.mubr.msk.f32.gmra.mrb[42].mxu0 %vm391_vm0, %v235_v28  ;;  %3234 = vmatmul.mubr.msk.f32.gmra.mrb[42].mxu1 %vm391_vm0, %v329_v29  ;;  %v267_v28 = vld [vmem:[%s3570_s7 + $0x258] sm:$0xff]  ;;  %v361_v29 = vld [vmem:[%s3570_s7 + $0x548] sm:$0xff] }
  0x6d   : > { %3095 = vmatprep.mubr.msk.f32.mxu0 %vm391_vm0, %v236_v30  ;;  %3236 = vmatprep.mubr.msk.f32.mxu1 %vm391_vm0, %v330_v31  ;;  %v268_v30 = vld [vmem:[%s3570_s7 + $0x260] sm:$0xff]  ;;  %v362_v31 = vld [vmem:[%s3570_s7 + $0x550] sm:$0xff] }
  0x70   : > { %3096 = vmatmul.mubr.msk.f32.gmra.mrb[44].mxu0 %vm391_vm0, %v237_v32  ;;  %3237 = vmatmul.mubr.msk.f32.gmra.mrb[44].mxu1 %vm391_vm0, %v331_v33  ;;  %v269_v32 = vld [vmem:[%s3570_s7 + $0x268] sm:$0xff]  ;;  %v363_v33 = vld [vmem:[%s3570_s7 + $0x558] sm:$0xff] }
  0x71   : > { %3098 = vmatprep.mubr.msk.f32.mxu0 %vm391_vm0, %v238_v34  ;;  %3239 = vmatprep.mubr.msk.f32.mxu1 %vm391_vm0, %v332_v35  ;;  %v270_v34 = vld [vmem:[%s3570_s7 + $0x270] sm:$0xff]  ;;  %v364_v35 = vld [vmem:[%s3570_s7 + $0x560] sm:$0xff] }
  0x74   : > { %3099 = vmatmul.mubr.msk.f32.gmra.mrb[46].mxu0 %vm391_vm0, %v239_v36  ;;  %3240 = vmatmul.mubr.msk.f32.gmra.mrb[46].mxu1 %vm391_vm0, %v333_v37  ;;  %v271_v36 = vld [vmem:[%s3570_s7 + $0x278] sm:$0xff]  ;;  %v365_v37 = vld [vmem:[%s3570_s7 + $0x568] sm:$0xff] }
  0x75   : > { %3101 = vmatprep.mubr.msk.f32.mxu0 %vm391_vm0, %v240_v38  ;;  %3242 = vmatprep.mubr.msk.f32.mxu1 %vm391_vm0, %v334_v39  ;;  %v272_v38 = vld [vmem:[%s3570_s7 + $0x280] sm:$0xff]  ;;  %v366_v39 = vld [vmem:[%s3570_s7 + $0x570] sm:$0xff] }
  0x78   : > { %3102 = vmatmul.mubr.msk.f32.gmra.mrb[48].mxu0 %vm391_vm0, %v241_v40  ;;  %3243 = vmatmul.mubr.msk.f32.gmra.mrb[48].mxu1 %vm391_vm0, %v335_v41  ;;  %v273_v40 = vld [vmem:[%s3570_s7 + $0x288] sm:$0xff]  ;;  %v367_v41 = vld [vmem:[%s3570_s7 + $0x578] sm:$0xff] }
  0x79   : > { %3104 = vmatprep.mubr.msk.f32.mxu0 %vm391_vm0, %v242_v42  ;;  %3245 = vmatprep.mubr.msk.f32.mxu1 %vm391_vm0, %v336_v43  ;;  %v274_v42 = vld [vmem:[%s3570_s7 + $0x290] sm:$0xff]  ;;  %v368_v43 = vld [vmem:[%s3570_s7 + $0x580] sm:$0xff] }
  0x7c   : > { %3105 = vmatmul.mubr.msk.f32.gmra.mrb[50].mxu0 %vm391_vm0, %v243_v44  ;;  %3246 = vmatmul.mubr.msk.f32.gmra.mrb[50].mxu1 %vm391_vm0, %v337_v45  ;;  %v275_v44 = vld [vmem:[%s3570_s7 + $0x298] sm:$0xff]  ;;  %v369_v45 = vld [vmem:[%s3570_s7 + $0x588] sm:$0xff] }
  0x7d   : > { %3107 = vmatprep.mubr.msk.f32.mxu0 %vm391_vm0, %v244_v46  ;;  %3248 = vmatprep.mubr.msk.f32.mxu1 %vm391_vm0, %v338_v47  ;;  %v276_v46 = vld [vmem:[%s3570_s7 + $0x2a0] sm:$0xff]  ;;  %v370_v47 = vld [vmem:[%s3570_s7 + $0x590] sm:$0xff] }
  0x80   : > { %3108 = vmatmul.mubr.msk.f32.gmra.mrb[52].mxu0 %vm391_vm0, %v245_v48  ;;  %3249 = vmatmul.mubr.msk.f32.gmra.mrb[52].mxu1 %vm391_vm0, %v339_v49  ;;  %v277_v48 = vld [vmem:[%s3570_s7 + $0x2a8] sm:$0xff]  ;;  %v371_v49 = vld [vmem:[%s3570_s7 + $0x598] sm:$0xff] }
  0x81   : > { %3110 = vmatprep.mubr.msk.f32.mxu0 %vm391_vm0, %v246_v50  ;;  %3251 = vmatprep.mubr.msk.f32.mxu1 %vm391_vm0, %v340_v51  ;;  %v278_v50 = vld [vmem:[%s3570_s7 + $0x2b0] sm:$0xff]  ;;  %v372_v51 = vld [vmem:[%s3570_s7 + $0x5a0] sm:$0xff] }
  0x84   : > { %3111 = vmatmul.mubr.msk.f32.gmra.mrb[54].mxu0 %vm391_vm0, %v247_v52  ;;  %3252 = vmatmul.mubr.msk.f32.gmra.mrb[54].mxu1 %vm391_vm0, %v341_v53  ;;  %v279_v52 = vld [vmem:[%s3570_s7 + $0x2b8] sm:$0xff]  ;;  %v373_v53 = vld [vmem:[%s3570_s7 + $0x5a8] sm:$0xff] }
  0x85   : > { %3113 = vmatprep.mubr.msk.f32.mxu0 %vm391_vm0, %v248_v54  ;;  %3254 = vmatprep.mubr.msk.f32.mxu1 %vm391_vm0, %v342_v55  ;;  %v280_v54 = vld [vmem:[%s3570_s7 + $0x2c0] sm:$0xff]  ;;  %v374_v55 = vld [vmem:[%s3570_s7 + $0x5b0] sm:$0xff] }
  0x88   : > { %3114 = vmatmul.mubr.msk.f32.gmra.mrb[56].mxu0 %vm391_vm0, %v249_v56  ;;  %3255 = vmatmul.mubr.msk.f32.gmra.mrb[56].mxu1 %vm391_vm0, %v343_v57  ;;  %v281_v56 = vld [vmem:[%s3570_s7 + $0x2c8] sm:$0xff]  ;;  %v375_v57 = vld [vmem:[%s3570_s7 + $0x5b8] sm:$0xff] }
  0x89   : > { %3116 = vmatprep.mubr.msk.f32.mxu0 %vm391_vm0, %v250_v58  ;;  %3257 = vmatprep.mubr.msk.f32.mxu1 %vm391_vm0, %v344_v59  ;;  %v282_v58 = vld [vmem:[%s3570_s7 + $0x2d0] sm:$0xff]  ;;  %v376_v59 = vld [vmem:[%s3570_s7 + $0x5c0] sm:$0xff] }
  0x8c   : > { %3117 = vmatmul.mubr.msk.f32.gmra.mrb[58].mxu0 %vm391_vm0, %v251_v60  ;;  %3258 = vmatmul.mubr.msk.f32.gmra.mrb[58].mxu1 %vm391_vm0, %v345_v61  ;;  %v283_v60 = vld [vmem:[%s3570_s7 + $0x2d8] sm:$0xff]  ;;  %v377_v61 = vld [vmem:[%s3570_s7 + $0x5c8] sm:$0xff] }
  0x8d   : > { %3119 = vmatprep.mubr.msk.f32.mxu0 %vm391_vm0, %v252_v62  ;;  %3260 = vmatprep.mubr.msk.f32.mxu1 %vm391_vm0, %v346_v63  ;;  %v284_v62 = vld [vmem:[%s3570_s7 + $0x2e0] sm:$0xff]  ;;  %v378_v63 = vld [vmem:[%s3570_s7 + $0x5d0] sm:$0xff] }
  0x90   : > { %3120 = vmatmul.mubr.msk.f32.gmra.mrb[60].mxu0 %vm391_vm0, %v253_v0  ;;  %3261 = vmatmul.mubr.msk.f32.gmra.mrb[60].mxu1 %vm391_vm0, %v347_v1  ;;  %v285_v0 = vld [vmem:[%s3570_s7 + $0x2e8] sm:$0xff]  ;;  %v379_v1 = vld [vmem:[%s3570_s7 + $0x5d8] sm:$0xff] }
  0x91   : > { %3122 = vmatprep.mubr.msk.f32.mxu0 %vm391_vm0, %v254_v2  ;;  %3263 = vmatprep.mubr.msk.f32.mxu1 %vm391_vm0, %v348_v3  ;;  %v3952_v2 = vld [vmem:[%s4713_s2] ss:$0 sm:$0xff] }
  0x94   : > { %3123 = vmatmul.mubr.msk.f32.gmra.mrb[62].mxu0 %vm391_vm0, %v255_v4  ;;  %3264 = vmatmul.mubr.msk.f32.gmra.mrb[62].mxu1 %vm391_vm0, %v349_v5 }
  0x95   : > { %3125 = vmatprep.mubr.msk.f32.mxu0 %vm391_vm0, %v256_v6  ;;  %3266 = vmatprep.mubr.msk.f32.mxu1 %vm391_vm0, %v350_v7 }
  0x98   : > { %3126 = vmatmul.mubr.msk.f32.gmra.mrb[64].mxu0 %vm391_vm0, %v257_v8  ;;  %3267 = vmatmul.mubr.msk.f32.gmra.mrb[64].mxu1 %vm391_vm0, %v351_v9 }
  0x99   : > { %3128 = vmatprep.mubr.msk.f32.mxu0 %vm391_vm0, %v258_v10  ;;  %3269 = vmatprep.mubr.msk.f32.mxu1 %vm391_vm0, %v352_v11 }
  0x9c   : > { %3129 = vmatmul.mubr.msk.f32.gmra.mrb[66].mxu0 %vm391_vm0, %v259_v12  ;;  %3270 = vmatmul.mubr.msk.f32.gmra.mrb[66].mxu1 %vm391_vm0, %v353_v13 }
  0x9d   : > { %3131 = vmatprep.mubr.msk.f32.mxu0 %vm391_vm0, %v260_v14  ;;  %3272 = vmatprep.mubr.msk.f32.mxu1 %vm391_vm0, %v354_v15 }
  0xa0   : > { %3132 = vmatmul.mubr.msk.f32.gmra.mrb[68].mxu0 %vm391_vm0, %v261_v16  ;;  %3273 = vmatmul.mubr.msk.f32.gmra.mrb[68].mxu1 %vm391_vm0, %v355_v17 }
  0xa1   : > { %3134 = vmatprep.mubr.msk.f32.mxu0 %vm391_vm0, %v262_v18  ;;  %3275 = vmatprep.mubr.msk.f32.mxu1 %vm391_vm0, %v356_v19 }
  0xa4   : > { %3135 = vmatmul.mubr.msk.f32.gmra.mrb[70].mxu0 %vm391_vm0, %v263_v20  ;;  %3276 = vmatmul.mubr.msk.f32.gmra.mrb[70].mxu1 %vm391_vm0, %v357_v21 }
  0xa5   : > { %3137 = vmatprep.mubr.msk.f32.mxu0 %vm391_vm0, %v264_v22  ;;  %3278 = vmatprep.mubr.msk.f32.mxu1 %vm391_vm0, %v358_v23 }
  0xa8   : > { %3138 = vmatmul.mubr.msk.f32.gmra.mrb[72].mxu0 %vm391_vm0, %v265_v24  ;;  %3279 = vmatmul.mubr.msk.f32.gmra.mrb[72].mxu1 %vm391_vm0, %v359_v25 }
  0xa9   : > { %3140 = vmatprep.mubr.msk.f32.mxu0 %vm391_vm0, %v266_v26  ;;  %3281 = vmatprep.mubr.msk.f32.mxu1 %vm391_vm0, %v360_v27 }
  0xac   : > { %3141 = vmatmul.mubr.msk.f32.gmra.mrb[74].mxu0 %vm391_vm0, %v267_v28  ;;  %3282 = vmatmul.mubr.msk.f32.gmra.mrb[74].mxu1 %vm391_vm0, %v361_v29 }
  0xad   : > { %3143 = vmatprep.mubr.msk.f32.mxu0 %vm391_vm0, %v268_v30  ;;  %3284 = vmatprep.mubr.msk.f32.mxu1 %vm391_vm0, %v362_v31 }
  0xb0   : > { %3144 = vmatmul.mubr.msk.f32.gmra.mrb[76].mxu0 %vm391_vm0, %v269_v32  ;;  %3285 = vmatmul.mubr.msk.f32.gmra.mrb[76].mxu1 %vm391_vm0, %v363_v33 }
  0xb1   : > { %3146 = vmatprep.mubr.msk.f32.mxu0 %vm391_vm0, %v270_v34  ;;  %3287 = vmatprep.mubr.msk.f32.mxu1 %vm391_vm0, %v364_v35 }
  0xb4   : > { %3147 = vmatmul.mubr.msk.f32.gmra.mrb[78].mxu0 %vm391_vm0, %v271_v36  ;;  %3288 = vmatmul.mubr.msk.f32.gmra.mrb[78].mxu1 %vm391_vm0, %v365_v37 }
  0xb5   : > { %3149 = vmatprep.mubr.msk.f32.mxu0 %vm391_vm0, %v272_v38  ;;  %3290 = vmatprep.mubr.msk.f32.mxu1 %vm391_vm0, %v366_v39 }
  0xb8   : > { %3150 = vmatmul.mubr.msk.f32.gmra.mrb[80].mxu0 %vm391_vm0, %v273_v40  ;;  %3291 = vmatmul.mubr.msk.f32.gmra.mrb[80].mxu1 %vm391_vm0, %v367_v41 }
  0xb9   : > { %3152 = vmatprep.mubr.msk.f32.mxu0 %vm391_vm0, %v274_v42  ;;  %3293 = vmatprep.mubr.msk.f32.mxu1 %vm391_vm0, %v368_v43 }
  0xbc   : > { %3153 = vmatmul.mubr.msk.f32.gmra.mrb[82].mxu0 %vm391_vm0, %v275_v44  ;;  %3294 = vmatmul.mubr.msk.f32.gmra.mrb[82].mxu1 %vm391_vm0, %v369_v45 }
  0xbd   : > { %3155 = vmatprep.mubr.msk.f32.mxu0 %vm391_vm0, %v276_v46  ;;  %3296 = vmatprep.mubr.msk.f32.mxu1 %vm391_vm0, %v370_v47 }
  0xc0   : > { %3156 = vmatmul.mubr.msk.f32.gmra.mrb[84].mxu0 %vm391_vm0, %v277_v48  ;;  %3297 = vmatmul.mubr.msk.f32.gmra.mrb[84].mxu1 %vm391_vm0, %v371_v49 }
  0xc1   : > { %3158 = vmatprep.mubr.msk.f32.mxu0 %vm391_vm0, %v278_v50  ;;  %3299 = vmatprep.mubr.msk.f32.mxu1 %vm391_vm0, %v372_v51 }
  0xc4   : > { %3159 = vmatmul.mubr.msk.f32.gmra.mrb[86].mxu0 %vm391_vm0, %v279_v52  ;;  %3300 = vmatmul.mubr.msk.f32.gmra.mrb[86].mxu1 %vm391_vm0, %v373_v53 }
  0xc5   : > { %3161 = vmatprep.mubr.msk.f32.mxu0 %vm391_vm0, %v280_v54  ;;  %3302 = vmatprep.mubr.msk.f32.mxu1 %vm391_vm0, %v374_v55 }
  0xc8   : > { %3162 = vmatmul.mubr.msk.f32.gmra.mrb[88].mxu0 %vm391_vm0, %v281_v56  ;;  %3303 = vmatmul.mubr.msk.f32.gmra.mrb[88].mxu1 %vm391_vm0, %v375_v57 }
  0xc9   : > { %3164 = vmatprep.mubr.msk.f32.mxu0 %vm391_vm0, %v282_v58  ;;  %3305 = vmatprep.mubr.msk.f32.mxu1 %vm391_vm0, %v376_v59 }
  0xcc   : > { %3165 = vmatmul.mubr.msk.f32.gmra.mrb[90].mxu0 %vm391_vm0, %v283_v60  ;;  %3306 = vmatmul.mubr.msk.f32.gmra.mrb[90].mxu1 %vm391_vm0, %v377_v61 }
  0xcd   : > { %3167 = vmatprep.mubr.msk.f32.mxu0 %vm391_vm0, %v284_v62  ;;  %3308 = vmatprep.mubr.msk.f32.mxu1 %vm391_vm0, %v378_v63 }
  0xd0   : > { %3168 = vmatmul.mubr.msk.f32.gmra.mrb[92].mxu0 %vm391_vm0, %v285_v0  ;;  %3309 = vmatmul.mubr.msk.f32.gmra.mrb[92].mxu1 %vm391_vm0, %v379_v1 }
  0xeb   : > { %v3031_v3 = vpop.f32.mrb[0].mxu0  ;;  %v3172_v4 = vpop.f32.mrb[0].mxu1 }
  0xec   : > { %v1028_v5 = vadd.f32 %v3031_v3, %v3952_v2  ;;  %v1498_v6 = vadd.f32 %v3172_v4, %v3952_v2  ;;  %v1022_v7 = vpop.f32.mrb[1].mxu0  ;;  %v1492_v8 = vpop.f32.mrb[1].mxu1 }
  0xed   : > { %v1023_v9 = vadd.f32 %v3952_v2, %v1022_v7  ;;  %v1493_v10 = vadd.f32 %v3952_v2, %v1492_v8 }
  0xee   : > { %1963 = vst.msk [vmem:[%s3958_s12 + $0x8] sm:$0xff] %vm1961_vm1, %v1028_v5  ;;  %2057 = vst.msk [vmem:[%s3958_s12 + $0x2f8] sm:$0xff] %vm1961_vm1, %v1498_v6 }
  0xef   : > { %1962 = vst.msk [vmem:[%s3958_s12] sm:$0xff] %vm1961_vm1, %v1023_v9  ;;  %2056 = vst.msk [vmem:[%s3958_s12 + $0x2f0] sm:$0xff] %vm1961_vm1, %v1493_v10  ;;  %v3034_v11 = vpop.f32.mrb[2].mxu0  ;;  %v3175_v12 = vpop.f32.mrb[2].mxu1 }
  0xf0   : > { %v1038_v13 = vadd.f32 %v3034_v11, %v3952_v2  ;;  %v1508_v14 = vadd.f32 %v3175_v12, %v3952_v2  ;;  %v1032_v15 = vpop.f32.mrb[3].mxu0  ;;  %v1502_v16 = vpop.f32.mrb[3].mxu1 }
  0xf1   : > { %v1033_v17 = vadd.f32 %v3952_v2, %v1032_v15  ;;  %v1503_v18 = vadd.f32 %v3952_v2, %v1502_v16 }
  0xf2   : > { %1965 = vst.msk [vmem:[%s3958_s12 + $0x18] sm:$0xff] %vm1961_vm1, %v1038_v13  ;;  %2059 = vst.msk [vmem:[%s3958_s12 + $0x308] sm:$0xff] %vm1961_vm1, %v1508_v14 }
  0xf3   : > { %1964 = vst.msk [vmem:[%s3958_s12 + $0x10] sm:$0xff] %vm1961_vm1, %v1033_v17  ;;  %2058 = vst.msk [vmem:[%s3958_s12 + $0x300] sm:$0xff] %vm1961_vm1, %v1503_v18  ;;  %v3037_v19 = vpop.f32.mrb[4].mxu0  ;;  %v3178_v20 = vpop.f32.mrb[4].mxu1 }
  0xf4   : > { %v1048_v21 = vadd.f32 %v3037_v19, %v3952_v2  ;;  %v1518_v22 = vadd.f32 %v3178_v20, %v3952_v2  ;;  %v1042_v23 = vpop.f32.mrb[5].mxu0  ;;  %v1512_v24 = vpop.f32.mrb[5].mxu1 }
  0xf5   : > { %v1043_v25 = vadd.f32 %v3952_v2, %v1042_v23  ;;  %v1513_v26 = vadd.f32 %v3952_v2, %v1512_v24 }
  0xf6   : > { %1967 = vst.msk [vmem:[%s3958_s12 + $0x28] sm:$0xff] %vm1961_vm1, %v1048_v21  ;;  %2061 = vst.msk [vmem:[%s3958_s12 + $0x318] sm:$0xff] %vm1961_vm1, %v1518_v22 }
  0xf7   : > { %1966 = vst.msk [vmem:[%s3958_s12 + $0x20] sm:$0xff] %vm1961_vm1, %v1043_v25  ;;  %2060 = vst.msk [vmem:[%s3958_s12 + $0x310] sm:$0xff] %vm1961_vm1, %v1513_v26  ;;  %v3040_v27 = vpop.f32.mrb[6].mxu0  ;;  %v3181_v28 = vpop.f32.mrb[6].mxu1 }
  0xf8   : > { %v1058_v29 = vadd.f32 %v3040_v27, %v3952_v2  ;;  %v1528_v30 = vadd.f32 %v3181_v28, %v3952_v2  ;;  %v1052_v31 = vpop.f32.mrb[7].mxu0  ;;  %v1522_v32 = vpop.f32.mrb[7].mxu1 }
  0xf9   : > { %v1053_v33 = vadd.f32 %v3952_v2, %v1052_v31  ;;  %v1523_v34 = vadd.f32 %v3952_v2, %v1522_v32 }
  0xfa   : > { %1969 = vst.msk [vmem:[%s3958_s12 + $0x38] sm:$0xff] %vm1961_vm1, %v1058_v29  ;;  %2063 = vst.msk [vmem:[%s3958_s12 + $0x328] sm:$0xff] %vm1961_vm1, %v1528_v30 }
  0xfb   : > { %1968 = vst.msk [vmem:[%s3958_s12 + $0x30] sm:$0xff] %vm1961_vm1, %v1053_v33  ;;  %2062 = vst.msk [vmem:[%s3958_s12 + $0x320] sm:$0xff] %vm1961_vm1, %v1523_v34  ;;  %v3043_v35 = vpop.f32.mrb[8].mxu0  ;;  %v3184_v36 = vpop.f32.mrb[8].mxu1 }
  0xfc   : > { %v1068_v37 = vadd.f32 %v3043_v35, %v3952_v2  ;;  %v1538_v38 = vadd.f32 %v3184_v36, %v3952_v2  ;;  %v1062_v39 = vpop.f32.mrb[9].mxu0  ;;  %v1532_v40 = vpop.f32.mrb[9].mxu1 }
  0xfd   : > { %v1063_v41 = vadd.f32 %v3952_v2, %v1062_v39  ;;  %v1533_v42 = vadd.f32 %v3952_v2, %v1532_v40 }
  0xfe   : > { %1971 = vst.msk [vmem:[%s3958_s12 + $0x48] sm:$0xff] %vm1961_vm1, %v1068_v37  ;;  %2065 = vst.msk [vmem:[%s3958_s12 + $0x338] sm:$0xff] %vm1961_vm1, %v1538_v38 }
  0xff   : > { %1970 = vst.msk [vmem:[%s3958_s12 + $0x40] sm:$0xff] %vm1961_vm1, %v1063_v41  ;;  %2064 = vst.msk [vmem:[%s3958_s12 + $0x330] sm:$0xff] %vm1961_vm1, %v1533_v42  ;;  %v3046_v43 = vpop.f32.mrb[10].mxu0  ;;  %v3187_v44 = vpop.f32.mrb[10].mxu1 }
 0x100   : > { %v1078_v45 = vadd.f32 %v3046_v43, %v3952_v2  ;;  %v1548_v46 = vadd.f32 %v3187_v44, %v3952_v2  ;;  %v1072_v47 = vpop.f32.mrb[11].mxu0  ;;  %v1542_v48 = vpop.f32.mrb[11].mxu1 }
 0x101   : > { %v1073_v49 = vadd.f32 %v3952_v2, %v1072_v47  ;;  %v1543_v50 = vadd.f32 %v3952_v2, %v1542_v48 }
 0x102   : > { %1973 = vst.msk [vmem:[%s3958_s12 + $0x58] sm:$0xff] %vm1961_vm1, %v1078_v45  ;;  %2067 = vst.msk [vmem:[%s3958_s12 + $0x348] sm:$0xff] %vm1961_vm1, %v1548_v46 }
 0x103   : > { %1972 = vst.msk [vmem:[%s3958_s12 + $0x50] sm:$0xff] %vm1961_vm1, %v1073_v49  ;;  %2066 = vst.msk [vmem:[%s3958_s12 + $0x340] sm:$0xff] %vm1961_vm1, %v1543_v50  ;;  %v3049_v51 = vpop.f32.mrb[12].mxu0  ;;  %v3190_v52 = vpop.f32.mrb[12].mxu1 }
 0x104   : > { %v1088_v53 = vadd.f32 %v3049_v51, %v3952_v2  ;;  %v1558_v54 = vadd.f32 %v3190_v52, %v3952_v2  ;;  %v1082_v55 = vpop.f32.mrb[13].mxu0  ;;  %v1552_v56 = vpop.f32.mrb[13].mxu1 }
 0x105   : > { %v1083_v57 = vadd.f32 %v3952_v2, %v1082_v55  ;;  %v1553_v58 = vadd.f32 %v3952_v2, %v1552_v56 }
 0x106   : > { %1975 = vst.msk [vmem:[%s3958_s12 + $0x68] sm:$0xff] %vm1961_vm1, %v1088_v53  ;;  %2069 = vst.msk [vmem:[%s3958_s12 + $0x358] sm:$0xff] %vm1961_vm1, %v1558_v54 }
 0x107   : > { %1974 = vst.msk [vmem:[%s3958_s12 + $0x60] sm:$0xff] %vm1961_vm1, %v1083_v57  ;;  %2068 = vst.msk [vmem:[%s3958_s12 + $0x350] sm:$0xff] %vm1961_vm1, %v1553_v58  ;;  %v3052_v59 = vpop.f32.mrb[14].mxu0  ;;  %v3193_v60 = vpop.f32.mrb[14].mxu1 }
 0x108   : > { %v1098_v61 = vadd.f32 %v3052_v59, %v3952_v2  ;;  %v1568_v62 = vadd.f32 %v3193_v60, %v3952_v2  ;;  %v1092_v63 = vpop.f32.mrb[15].mxu0  ;;  %v1562_v0 = vpop.f32.mrb[15].mxu1 }
 0x109   : > { %v1093_v1 = vadd.f32 %v3952_v2, %v1092_v63  ;;  %v1563_v3 = vadd.f32 %v3952_v2, %v1562_v0 }
 0x10a   : > { %1977 = vst.msk [vmem:[%s3958_s12 + $0x78] sm:$0xff] %vm1961_vm1, %v1098_v61  ;;  %2071 = vst.msk [vmem:[%s3958_s12 + $0x368] sm:$0xff] %vm1961_vm1, %v1568_v62 }
 0x10b   : > { %1976 = vst.msk [vmem:[%s3958_s12 + $0x70] sm:$0xff] %vm1961_vm1, %v1093_v1  ;;  %2070 = vst.msk [vmem:[%s3958_s12 + $0x360] sm:$0xff] %vm1961_vm1, %v1563_v3  ;;  %v3055_v4 = vpop.f32.mrb[16].mxu0  ;;  %v3196_v5 = vpop.f32.mrb[16].mxu1 }
 0x10c   : > { %v1108_v6 = vadd.f32 %v3055_v4, %v3952_v2  ;;  %v1578_v7 = vadd.f32 %v3196_v5, %v3952_v2  ;;  %v1102_v8 = vpop.f32.mrb[17].mxu0  ;;  %v1572_v9 = vpop.f32.mrb[17].mxu1 }
 0x10d   : > { %v1103_v10 = vadd.f32 %v3952_v2, %v1102_v8  ;;  %v1573_v11 = vadd.f32 %v3952_v2, %v1572_v9 }
 0x10e   : > { %1979 = vst.msk [vmem:[%s3958_s12 + $0x88] sm:$0xff] %vm1961_vm1, %v1108_v6  ;;  %2073 = vst.msk [vmem:[%s3958_s12 + $0x378] sm:$0xff] %vm1961_vm1, %v1578_v7 }
 0x10f   : > { %1978 = vst.msk [vmem:[%s3958_s12 + $0x80] sm:$0xff] %vm1961_vm1, %v1103_v10  ;;  %2072 = vst.msk [vmem:[%s3958_s12 + $0x370] sm:$0xff] %vm1961_vm1, %v1573_v11  ;;  %v3058_v12 = vpop.f32.mrb[18].mxu0  ;;  %v3199_v13 = vpop.f32.mrb[18].mxu1 }
 0x110   : > { %v1118_v14 = vadd.f32 %v3058_v12, %v3952_v2  ;;  %v1588_v15 = vadd.f32 %v3199_v13, %v3952_v2  ;;  %v1112_v16 = vpop.f32.mrb[19].mxu0  ;;  %v1582_v17 = vpop.f32.mrb[19].mxu1 }
 0x111   : > { %v1113_v18 = vadd.f32 %v3952_v2, %v1112_v16  ;;  %v1583_v19 = vadd.f32 %v3952_v2, %v1582_v17 }
 0x112   : > { %1981 = vst.msk [vmem:[%s3958_s12 + $0x98] sm:$0xff] %vm1961_vm1, %v1118_v14  ;;  %2075 = vst.msk [vmem:[%s3958_s12 + $0x388] sm:$0xff] %vm1961_vm1, %v1588_v15 }
 0x113   : > { %1980 = vst.msk [vmem:[%s3958_s12 + $0x90] sm:$0xff] %vm1961_vm1, %v1113_v18  ;;  %2074 = vst.msk [vmem:[%s3958_s12 + $0x380] sm:$0xff] %vm1961_vm1, %v1583_v19  ;;  %v3061_v20 = vpop.f32.mrb[20].mxu0  ;;  %v3202_v21 = vpop.f32.mrb[20].mxu1 }
 0x114   : > { %v1128_v22 = vadd.f32 %v3061_v20, %v3952_v2  ;;  %v1598_v23 = vadd.f32 %v3202_v21, %v3952_v2  ;;  %v1122_v24 = vpop.f32.mrb[21].mxu0  ;;  %v1592_v25 = vpop.f32.mrb[21].mxu1 }
 0x115   : > { %v1123_v26 = vadd.f32 %v3952_v2, %v1122_v24  ;;  %v1593_v27 = vadd.f32 %v3952_v2, %v1592_v25 }
 0x116   : > { %1983 = vst.msk [vmem:[%s3958_s12 + $0xa8] sm:$0xff] %vm1961_vm1, %v1128_v22  ;;  %2077 = vst.msk [vmem:[%s3958_s12 + $0x398] sm:$0xff] %vm1961_vm1, %v1598_v23 }
 0x117   : > { %1982 = vst.msk [vmem:[%s3958_s12 + $0xa0] sm:$0xff] %vm1961_vm1, %v1123_v26  ;;  %2076 = vst.msk [vmem:[%s3958_s12 + $0x390] sm:$0xff] %vm1961_vm1, %v1593_v27  ;;  %v3064_v28 = vpop.f32.mrb[22].mxu0  ;;  %v3205_v29 = vpop.f32.mrb[22].mxu1 }
 0x118   : > { %v1138_v30 = vadd.f32 %v3064_v28, %v3952_v2  ;;  %v1608_v31 = vadd.f32 %v3205_v29, %v3952_v2  ;;  %v1132_v32 = vpop.f32.mrb[23].mxu0  ;;  %v1602_v33 = vpop.f32.mrb[23].mxu1 }
 0x119   : > { %v1133_v34 = vadd.f32 %v3952_v2, %v1132_v32  ;;  %v1603_v35 = vadd.f32 %v3952_v2, %v1602_v33 }
 0x11a   : > { %1985 = vst.msk [vmem:[%s3958_s12 + $0xb8] sm:$0xff] %vm1961_vm1, %v1138_v30  ;;  %2079 = vst.msk [vmem:[%s3958_s12 + $0x3a8] sm:$0xff] %vm1961_vm1, %v1608_v31 }
 0x11b   : > { %1984 = vst.msk [vmem:[%s3958_s12 + $0xb0] sm:$0xff] %vm1961_vm1, %v1133_v34  ;;  %2078 = vst.msk [vmem:[%s3958_s12 + $0x3a0] sm:$0xff] %vm1961_vm1, %v1603_v35  ;;  %v3067_v36 = vpop.f32.mrb[24].mxu0  ;;  %v3208_v37 = vpop.f32.mrb[24].mxu1 }
 0x11c   : > { %v1148_v38 = vadd.f32 %v3067_v36, %v3952_v2  ;;  %v1618_v39 = vadd.f32 %v3208_v37, %v3952_v2  ;;  %v1142_v40 = vpop.f32.mrb[25].mxu0  ;;  %v1612_v41 = vpop.f32.mrb[25].mxu1 }
 0x11d   : > { %v1143_v42 = vadd.f32 %v3952_v2, %v1142_v40  ;;  %v1613_v43 = vadd.f32 %v3952_v2, %v1612_v41 }
 0x11e   : > { %1987 = vst.msk [vmem:[%s3958_s12 + $0xc8] sm:$0xff] %vm1961_vm1, %v1148_v38  ;;  %2081 = vst.msk [vmem:[%s3958_s12 + $0x3b8] sm:$0xff] %vm1961_vm1, %v1618_v39 }
 0x11f   : > { %1986 = vst.msk [vmem:[%s3958_s12 + $0xc0] sm:$0xff] %vm1961_vm1, %v1143_v42  ;;  %2080 = vst.msk [vmem:[%s3958_s12 + $0x3b0] sm:$0xff] %vm1961_vm1, %v1613_v43  ;;  %v3070_v44 = vpop.f32.mrb[26].mxu0  ;;  %v3211_v45 = vpop.f32.mrb[26].mxu1 }
 0x120   : > { %v1158_v46 = vadd.f32 %v3070_v44, %v3952_v2  ;;  %v1628_v47 = vadd.f32 %v3211_v45, %v3952_v2  ;;  %v1152_v48 = vpop.f32.mrb[27].mxu0  ;;  %v1622_v49 = vpop.f32.mrb[27].mxu1 }
 0x121   : > { %v1153_v50 = vadd.f32 %v3952_v2, %v1152_v48  ;;  %v1623_v51 = vadd.f32 %v3952_v2, %v1622_v49 }
 0x122   : > { %1989 = vst.msk [vmem:[%s3958_s12 + $0xd8] sm:$0xff] %vm1961_vm1, %v1158_v46  ;;  %2083 = vst.msk [vmem:[%s3958_s12 + $0x3c8] sm:$0xff] %vm1961_vm1, %v1628_v47 }
 0x123   : > { %1988 = vst.msk [vmem:[%s3958_s12 + $0xd0] sm:$0xff] %vm1961_vm1, %v1153_v50  ;;  %2082 = vst.msk [vmem:[%s3958_s12 + $0x3c0] sm:$0xff] %vm1961_vm1, %v1623_v51  ;;  %v3073_v52 = vpop.f32.mrb[28].mxu0  ;;  %v3214_v53 = vpop.f32.mrb[28].mxu1 }
 0x124   : > { %v1168_v54 = vadd.f32 %v3073_v52, %v3952_v2  ;;  %v1638_v55 = vadd.f32 %v3214_v53, %v3952_v2  ;;  %v1162_v56 = vpop.f32.mrb[29].mxu0  ;;  %v1632_v57 = vpop.f32.mrb[29].mxu1 }
 0x125   : > { %v1163_v58 = vadd.f32 %v3952_v2, %v1162_v56  ;;  %v1633_v59 = vadd.f32 %v3952_v2, %v1632_v57 }
 0x126   : > { %1991 = vst.msk [vmem:[%s3958_s12 + $0xe8] sm:$0xff] %vm1961_vm1, %v1168_v54  ;;  %2085 = vst.msk [vmem:[%s3958_s12 + $0x3d8] sm:$0xff] %vm1961_vm1, %v1638_v55 }
 0x127   : > { %1990 = vst.msk [vmem:[%s3958_s12 + $0xe0] sm:$0xff] %vm1961_vm1, %v1163_v58  ;;  %2084 = vst.msk [vmem:[%s3958_s12 + $0x3d0] sm:$0xff] %vm1961_vm1, %v1633_v59  ;;  %v3076_v60 = vpop.f32.mrb[30].mxu0  ;;  %v3217_v61 = vpop.f32.mrb[30].mxu1 }
 0x128   : > { %v1178_v62 = vadd.f32 %v3076_v60, %v3952_v2  ;;  %v1648_v63 = vadd.f32 %v3217_v61, %v3952_v2  ;;  %v1172_v0 = vpop.f32.mrb[31].mxu0  ;;  %v1642_v1 = vpop.f32.mrb[31].mxu1 }
 0x129   : > { %v1173_v3 = vadd.f32 %v3952_v2, %v1172_v0  ;;  %v1643_v4 = vadd.f32 %v3952_v2, %v1642_v1 }
 0x12a   : > { %1993 = vst.msk [vmem:[%s3958_s12 + $0xf8] sm:$0xff] %vm1961_vm1, %v1178_v62  ;;  %2087 = vst.msk [vmem:[%s3958_s12 + $0x3e8] sm:$0xff] %vm1961_vm1, %v1648_v63 }
 0x12b   : > { %1992 = vst.msk [vmem:[%s3958_s12 + $0xf0] sm:$0xff] %vm1961_vm1, %v1173_v3  ;;  %2086 = vst.msk [vmem:[%s3958_s12 + $0x3e0] sm:$0xff] %vm1961_vm1, %v1643_v4  ;;  %v3079_v5 = vpop.f32.mrb[32].mxu0  ;;  %v3220_v6 = vpop.f32.mrb[32].mxu1 }
 0x12c   : > { %v1188_v7 = vadd.f32 %v3079_v5, %v3952_v2  ;;  %v1658_v8 = vadd.f32 %v3220_v6, %v3952_v2  ;;  %v1182_v9 = vpop.f32.mrb[33].mxu0  ;;  %v1652_v10 = vpop.f32.mrb[33].mxu1 }
 0x12d   : > { %v1183_v11 = vadd.f32 %v3952_v2, %v1182_v9  ;;  %v1653_v12 = vadd.f32 %v3952_v2, %v1652_v10 }
 0x12e   : > { %1995 = vst.msk [vmem:[%s3958_s12 + $0x108] sm:$0xff] %vm1961_vm1, %v1188_v7  ;;  %2089 = vst.msk [vmem:[%s3958_s12 + $0x3f8] sm:$0xff] %vm1961_vm1, %v1658_v8 }
 0x12f   : > { %1994 = vst.msk [vmem:[%s3958_s12 + $0x100] sm:$0xff] %vm1961_vm1, %v1183_v11  ;;  %2088 = vst.msk [vmem:[%s3958_s12 + $0x3f0] sm:$0xff] %vm1961_vm1, %v1653_v12  ;;  %v3082_v13 = vpop.f32.mrb[34].mxu0  ;;  %v3223_v14 = vpop.f32.mrb[34].mxu1 }
 0x130   : > { %v1198_v15 = vadd.f32 %v3082_v13, %v3952_v2  ;;  %v1668_v16 = vadd.f32 %v3223_v14, %v3952_v2  ;;  %v1192_v17 = vpop.f32.mrb[35].mxu0  ;;  %v1662_v18 = vpop.f32.mrb[35].mxu1 }
 0x131   : > { %v1193_v19 = vadd.f32 %v3952_v2, %v1192_v17  ;;  %v1663_v20 = vadd.f32 %v3952_v2, %v1662_v18 }
 0x132   : > { %1997 = vst.msk [vmem:[%s3958_s12 + $0x118] sm:$0xff] %vm1961_vm1, %v1198_v15  ;;  %2091 = vst.msk [vmem:[%s3958_s12 + $0x408] sm:$0xff] %vm1961_vm1, %v1668_v16 }
 0x133   : > { %1996 = vst.msk [vmem:[%s3958_s12 + $0x110] sm:$0xff] %vm1961_vm1, %v1193_v19  ;;  %2090 = vst.msk [vmem:[%s3958_s12 + $0x400] sm:$0xff] %vm1961_vm1, %v1663_v20  ;;  %v3085_v21 = vpop.f32.mrb[36].mxu0  ;;  %v3226_v22 = vpop.f32.mrb[36].mxu1 }
 0x134   : > { %v1208_v23 = vadd.f32 %v3085_v21, %v3952_v2  ;;  %v1678_v24 = vadd.f32 %v3226_v22, %v3952_v2  ;;  %v1202_v25 = vpop.f32.mrb[37].mxu0  ;;  %v1672_v26 = vpop.f32.mrb[37].mxu1 }
 0x135   : > { %v1203_v27 = vadd.f32 %v3952_v2, %v1202_v25  ;;  %v1673_v28 = vadd.f32 %v3952_v2, %v1672_v26 }
 0x136   : > { %1999 = vst.msk [vmem:[%s3958_s12 + $0x128] sm:$0xff] %vm1961_vm1, %v1208_v23  ;;  %2093 = vst.msk [vmem:[%s3958_s12 + $0x418] sm:$0xff] %vm1961_vm1, %v1678_v24 }
 0x137   : > { %1998 = vst.msk [vmem:[%s3958_s12 + $0x120] sm:$0xff] %vm1961_vm1, %v1203_v27  ;;  %2092 = vst.msk [vmem:[%s3958_s12 + $0x410] sm:$0xff] %vm1961_vm1, %v1673_v28  ;;  %v3088_v29 = vpop.f32.mrb[38].mxu0  ;;  %v3229_v30 = vpop.f32.mrb[38].mxu1 }
 0x138   : > { %v1218_v31 = vadd.f32 %v3088_v29, %v3952_v2  ;;  %v1688_v32 = vadd.f32 %v3229_v30, %v3952_v2  ;;  %v1212_v33 = vpop.f32.mrb[39].mxu0  ;;  %v1682_v34 = vpop.f32.mrb[39].mxu1 }
 0x139   : > { %v1213_v35 = vadd.f32 %v3952_v2, %v1212_v33  ;;  %v1683_v36 = vadd.f32 %v3952_v2, %v1682_v34 }
 0x13a   : > { %2001 = vst.msk [vmem:[%s3958_s12 + $0x138] sm:$0xff] %vm1961_vm1, %v1218_v31  ;;  %2095 = vst.msk [vmem:[%s3958_s12 + $0x428] sm:$0xff] %vm1961_vm1, %v1688_v32 }
 0x13b   : > { %2000 = vst.msk [vmem:[%s3958_s12 + $0x130] sm:$0xff] %vm1961_vm1, %v1213_v35  ;;  %2094 = vst.msk [vmem:[%s3958_s12 + $0x420] sm:$0xff] %vm1961_vm1, %v1683_v36  ;;  %v3091_v37 = vpop.f32.mrb[40].mxu0  ;;  %v3232_v38 = vpop.f32.mrb[40].mxu1 }
 0x13c   : > { %v1228_v39 = vadd.f32 %v3091_v37, %v3952_v2  ;;  %v1698_v40 = vadd.f32 %v3232_v38, %v3952_v2  ;;  %v1222_v41 = vpop.f32.mrb[41].mxu0  ;;  %v1692_v42 = vpop.f32.mrb[41].mxu1 }
 0x13d   : > { %v1223_v43 = vadd.f32 %v3952_v2, %v1222_v41  ;;  %v1693_v44 = vadd.f32 %v3952_v2, %v1692_v42 }
 0x13e   : > { %2003 = vst.msk [vmem:[%s3958_s12 + $0x148] sm:$0xff] %vm1961_vm1, %v1228_v39  ;;  %2097 = vst.msk [vmem:[%s3958_s12 + $0x438] sm:$0xff] %vm1961_vm1, %v1698_v40 }
 0x13f   : > { %2002 = vst.msk [vmem:[%s3958_s12 + $0x140] sm:$0xff] %vm1961_vm1, %v1223_v43  ;;  %2096 = vst.msk [vmem:[%s3958_s12 + $0x430] sm:$0xff] %vm1961_vm1, %v1693_v44  ;;  %v3094_v45 = vpop.f32.mrb[42].mxu0  ;;  %v3235_v46 = vpop.f32.mrb[42].mxu1 }
 0x140   : > { %v1238_v47 = vadd.f32 %v3094_v45, %v3952_v2  ;;  %v1708_v48 = vadd.f32 %v3235_v46, %v3952_v2  ;;  %v1232_v49 = vpop.f32.mrb[43].mxu0  ;;  %v1702_v50 = vpop.f32.mrb[43].mxu1 }
 0x141   : > { %v1233_v51 = vadd.f32 %v3952_v2, %v1232_v49  ;;  %v1703_v52 = vadd.f32 %v3952_v2, %v1702_v50 }
 0x142   : > { %2005 = vst.msk [vmem:[%s3958_s12 + $0x158] sm:$0xff] %vm1961_vm1, %v1238_v47  ;;  %2099 = vst.msk [vmem:[%s3958_s12 + $0x448] sm:$0xff] %vm1961_vm1, %v1708_v48 }
 0x143   : > { %2004 = vst.msk [vmem:[%s3958_s12 + $0x150] sm:$0xff] %vm1961_vm1, %v1233_v51  ;;  %2098 = vst.msk [vmem:[%s3958_s12 + $0x440] sm:$0xff] %vm1961_vm1, %v1703_v52  ;;  %v3097_v53 = vpop.f32.mrb[44].mxu0  ;;  %v3238_v54 = vpop.f32.mrb[44].mxu1 }
 0x144   : > { %v1248_v55 = vadd.f32 %v3097_v53, %v3952_v2  ;;  %v1718_v56 = vadd.f32 %v3238_v54, %v3952_v2  ;;  %v1242_v57 = vpop.f32.mrb[45].mxu0  ;;  %v1712_v58 = vpop.f32.mrb[45].mxu1 }
 0x145   : > { %v1243_v59 = vadd.f32 %v3952_v2, %v1242_v57  ;;  %v1713_v60 = vadd.f32 %v3952_v2, %v1712_v58 }
 0x146   : > { %2007 = vst.msk [vmem:[%s3958_s12 + $0x168] sm:$0xff] %vm1961_vm1, %v1248_v55  ;;  %2101 = vst.msk [vmem:[%s3958_s12 + $0x458] sm:$0xff] %vm1961_vm1, %v1718_v56 }
 0x147   : > { %2006 = vst.msk [vmem:[%s3958_s12 + $0x160] sm:$0xff] %vm1961_vm1, %v1243_v59  ;;  %2100 = vst.msk [vmem:[%s3958_s12 + $0x450] sm:$0xff] %vm1961_vm1, %v1713_v60  ;;  %v3100_v61 = vpop.f32.mrb[46].mxu0  ;;  %v3241_v62 = vpop.f32.mrb[46].mxu1 }
 0x148   : > { %v1258_v63 = vadd.f32 %v3100_v61, %v3952_v2  ;;  %v1728_v0 = vadd.f32 %v3241_v62, %v3952_v2  ;;  %v1252_v1 = vpop.f32.mrb[47].mxu0  ;;  %v1722_v3 = vpop.f32.mrb[47].mxu1 }
 0x149   : > { %v1253_v4 = vadd.f32 %v3952_v2, %v1252_v1  ;;  %v1723_v5 = vadd.f32 %v3952_v2, %v1722_v3 }
 0x14a   : > { %2009 = vst.msk [vmem:[%s3958_s12 + $0x178] sm:$0xff] %vm1961_vm1, %v1258_v63  ;;  %2103 = vst.msk [vmem:[%s3958_s12 + $0x468] sm:$0xff] %vm1961_vm1, %v1728_v0 }
 0x14b   : > { %2008 = vst.msk [vmem:[%s3958_s12 + $0x170] sm:$0xff] %vm1961_vm1, %v1253_v4  ;;  %2102 = vst.msk [vmem:[%s3958_s12 + $0x460] sm:$0xff] %vm1961_vm1, %v1723_v5  ;;  %v3103_v6 = vpop.f32.mrb[48].mxu0  ;;  %v3244_v7 = vpop.f32.mrb[48].mxu1 }
 0x14c   : > { %v1268_v8 = vadd.f32 %v3103_v6, %v3952_v2  ;;  %v1738_v9 = vadd.f32 %v3244_v7, %v3952_v2  ;;  %v1262_v10 = vpop.f32.mrb[49].mxu0  ;;  %v1732_v11 = vpop.f32.mrb[49].mxu1 }
 0x14d   : > { %v1263_v12 = vadd.f32 %v3952_v2, %v1262_v10  ;;  %v1733_v13 = vadd.f32 %v3952_v2, %v1732_v11 }
 0x14e   : > { %2011 = vst.msk [vmem:[%s3958_s12 + $0x188] sm:$0xff] %vm1961_vm1, %v1268_v8  ;;  %2105 = vst.msk [vmem:[%s3958_s12 + $0x478] sm:$0xff] %vm1961_vm1, %v1738_v9 }
 0x14f   : > { %2010 = vst.msk [vmem:[%s3958_s12 + $0x180] sm:$0xff] %vm1961_vm1, %v1263_v12  ;;  %2104 = vst.msk [vmem:[%s3958_s12 + $0x470] sm:$0xff] %vm1961_vm1, %v1733_v13  ;;  %v3106_v14 = vpop.f32.mrb[50].mxu0  ;;  %v3247_v15 = vpop.f32.mrb[50].mxu1 }
 0x150   : > { %v1278_v16 = vadd.f32 %v3106_v14, %v3952_v2  ;;  %v1748_v17 = vadd.f32 %v3247_v15, %v3952_v2  ;;  %v1272_v18 = vpop.f32.mrb[51].mxu0  ;;  %v1742_v19 = vpop.f32.mrb[51].mxu1 }
 0x151   : > { %v1273_v20 = vadd.f32 %v3952_v2, %v1272_v18  ;;  %v1743_v21 = vadd.f32 %v3952_v2, %v1742_v19 }
 0x152   : > { %2013 = vst.msk [vmem:[%s3958_s12 + $0x198] sm:$0xff] %vm1961_vm1, %v1278_v16  ;;  %2107 = vst.msk [vmem:[%s3958_s12 + $0x488] sm:$0xff] %vm1961_vm1, %v1748_v17 }
 0x153   : > { %2012 = vst.msk [vmem:[%s3958_s12 + $0x190] sm:$0xff] %vm1961_vm1, %v1273_v20  ;;  %2106 = vst.msk [vmem:[%s3958_s12 + $0x480] sm:$0xff] %vm1961_vm1, %v1743_v21  ;;  %v3109_v22 = vpop.f32.mrb[52].mxu0  ;;  %v3250_v23 = vpop.f32.mrb[52].mxu1 }
 0x154   : > { %v1288_v24 = vadd.f32 %v3109_v22, %v3952_v2  ;;  %v1758_v25 = vadd.f32 %v3250_v23, %v3952_v2  ;;  %v1282_v26 = vpop.f32.mrb[53].mxu0  ;;  %v1752_v27 = vpop.f32.mrb[53].mxu1 }
 0x155   : > { %v1283_v28 = vadd.f32 %v3952_v2, %v1282_v26  ;;  %v1753_v29 = vadd.f32 %v3952_v2, %v1752_v27 }
 0x156   : > { %2015 = vst.msk [vmem:[%s3958_s12 + $0x1a8] sm:$0xff] %vm1961_vm1, %v1288_v24  ;;  %2109 = vst.msk [vmem:[%s3958_s12 + $0x498] sm:$0xff] %vm1961_vm1, %v1758_v25 }
 0x157   : > { %2014 = vst.msk [vmem:[%s3958_s12 + $0x1a0] sm:$0xff] %vm1961_vm1, %v1283_v28  ;;  %2108 = vst.msk [vmem:[%s3958_s12 + $0x490] sm:$0xff] %vm1961_vm1, %v1753_v29  ;;  %v3112_v30 = vpop.f32.mrb[54].mxu0  ;;  %v3253_v31 = vpop.f32.mrb[54].mxu1 }
 0x158   : > { %v1298_v32 = vadd.f32 %v3112_v30, %v3952_v2  ;;  %v1768_v33 = vadd.f32 %v3253_v31, %v3952_v2  ;;  %v1292_v34 = vpop.f32.mrb[55].mxu0  ;;  %v1762_v35 = vpop.f32.mrb[55].mxu1 }
 0x159   : > { %v1293_v36 = vadd.f32 %v3952_v2, %v1292_v34  ;;  %v1763_v37 = vadd.f32 %v3952_v2, %v1762_v35 }
 0x15a   : > { %2017 = vst.msk [vmem:[%s3958_s12 + $0x1b8] sm:$0xff] %vm1961_vm1, %v1298_v32  ;;  %2111 = vst.msk [vmem:[%s3958_s12 + $0x4a8] sm:$0xff] %vm1961_vm1, %v1768_v33 }
 0x15b   : > { %2016 = vst.msk [vmem:[%s3958_s12 + $0x1b0] sm:$0xff] %vm1961_vm1, %v1293_v36  ;;  %2110 = vst.msk [vmem:[%s3958_s12 + $0x4a0] sm:$0xff] %vm1961_vm1, %v1763_v37  ;;  %v3115_v38 = vpop.f32.mrb[56].mxu0  ;;  %v3256_v39 = vpop.f32.mrb[56].mxu1 }
 0x15c   : > { %v1308_v40 = vadd.f32 %v3115_v38, %v3952_v2  ;;  %v1778_v41 = vadd.f32 %v3256_v39, %v3952_v2  ;;  %v1302_v42 = vpop.f32.mrb[57].mxu0  ;;  %v1772_v43 = vpop.f32.mrb[57].mxu1 }
 0x15d   : > { %v1303_v44 = vadd.f32 %v3952_v2, %v1302_v42  ;;  %v1773_v45 = vadd.f32 %v3952_v2, %v1772_v43 }
 0x15e   : > { %2019 = vst.msk [vmem:[%s3958_s12 + $0x1c8] sm:$0xff] %vm1961_vm1, %v1308_v40  ;;  %2113 = vst.msk [vmem:[%s3958_s12 + $0x4b8] sm:$0xff] %vm1961_vm1, %v1778_v41 }
 0x15f   : > { %2018 = vst.msk [vmem:[%s3958_s12 + $0x1c0] sm:$0xff] %vm1961_vm1, %v1303_v44  ;;  %2112 = vst.msk [vmem:[%s3958_s12 + $0x4b0] sm:$0xff] %vm1961_vm1, %v1773_v45  ;;  %v3118_v46 = vpop.f32.mrb[58].mxu0  ;;  %v3259_v47 = vpop.f32.mrb[58].mxu1 }
 0x160   : > { %v1318_v48 = vadd.f32 %v3118_v46, %v3952_v2  ;;  %v1788_v49 = vadd.f32 %v3259_v47, %v3952_v2  ;;  %v1312_v50 = vpop.f32.mrb[59].mxu0  ;;  %v1782_v51 = vpop.f32.mrb[59].mxu1 }
 0x161   : > { %v1313_v52 = vadd.f32 %v3952_v2, %v1312_v50  ;;  %v1783_v53 = vadd.f32 %v3952_v2, %v1782_v51 }
 0x162   : > { %2021 = vst.msk [vmem:[%s3958_s12 + $0x1d8] sm:$0xff] %vm1961_vm1, %v1318_v48  ;;  %2115 = vst.msk [vmem:[%s3958_s12 + $0x4c8] sm:$0xff] %vm1961_vm1, %v1788_v49 }
 0x163   : > { %2020 = vst.msk [vmem:[%s3958_s12 + $0x1d0] sm:$0xff] %vm1961_vm1, %v1313_v52  ;;  %2114 = vst.msk [vmem:[%s3958_s12 + $0x4c0] sm:$0xff] %vm1961_vm1, %v1783_v53  ;;  %v3121_v54 = vpop.f32.mrb[60].mxu0  ;;  %v3262_v55 = vpop.f32.mrb[60].mxu1 }
 0x164   : > { %v1328_v56 = vadd.f32 %v3121_v54, %v3952_v2  ;;  %v1798_v57 = vadd.f32 %v3262_v55, %v3952_v2  ;;  %v1322_v58 = vpop.f32.mrb[61].mxu0  ;;  %v1792_v59 = vpop.f32.mrb[61].mxu1 }
 0x165   : > { %v1323_v60 = vadd.f32 %v3952_v2, %v1322_v58  ;;  %v1793_v61 = vadd.f32 %v3952_v2, %v1792_v59 }
 0x166   : > { %2023 = vst.msk [vmem:[%s3958_s12 + $0x1e8] sm:$0xff] %vm1961_vm1, %v1328_v56  ;;  %2117 = vst.msk [vmem:[%s3958_s12 + $0x4d8] sm:$0xff] %vm1961_vm1, %v1798_v57 }
 0x167   : > { %2022 = vst.msk [vmem:[%s3958_s12 + $0x1e0] sm:$0xff] %vm1961_vm1, %v1323_v60  ;;  %2116 = vst.msk [vmem:[%s3958_s12 + $0x4d0] sm:$0xff] %vm1961_vm1, %v1793_v61  ;;  %v3124_v62 = vpop.f32.mrb[62].mxu0  ;;  %v3265_v63 = vpop.f32.mrb[62].mxu1 }
 0x168   : > { %v1338_v0 = vadd.f32 %v3124_v62, %v3952_v2  ;;  %v1808_v1 = vadd.f32 %v3265_v63, %v3952_v2  ;;  %v1332_v3 = vpop.f32.mrb[63].mxu0  ;;  %v1802_v4 = vpop.f32.mrb[63].mxu1 }
 0x169   : > { %v1333_v5 = vadd.f32 %v3952_v2, %v1332_v3  ;;  %v1803_v6 = vadd.f32 %v3952_v2, %v1802_v4 }
 0x16a   : > { %2025 = vst.msk [vmem:[%s3958_s12 + $0x1f8] sm:$0xff] %vm1961_vm1, %v1338_v0  ;;  %2119 = vst.msk [vmem:[%s3958_s12 + $0x4e8] sm:$0xff] %vm1961_vm1, %v1808_v1 }
 0x16b   : > { %2024 = vst.msk [vmem:[%s3958_s12 + $0x1f0] sm:$0xff] %vm1961_vm1, %v1333_v5  ;;  %2118 = vst.msk [vmem:[%s3958_s12 + $0x4e0] sm:$0xff] %vm1961_vm1, %v1803_v6  ;;  %v3127_v7 = vpop.f32.mrb[64].mxu0  ;;  %v3268_v8 = vpop.f32.mrb[64].mxu1 }
 0x16c   : > { %v1348_v9 = vadd.f32 %v3127_v7, %v3952_v2  ;;  %v1818_v10 = vadd.f32 %v3268_v8, %v3952_v2  ;;  %v1342_v11 = vpop.f32.mrb[65].mxu0  ;;  %v1812_v12 = vpop.f32.mrb[65].mxu1 }
 0x16d   : > { %v1343_v13 = vadd.f32 %v3952_v2, %v1342_v11  ;;  %v1813_v14 = vadd.f32 %v3952_v2, %v1812_v12 }
 0x16e   : > { %2027 = vst.msk [vmem:[%s3958_s12 + $0x208] sm:$0xff] %vm1961_vm1, %v1348_v9  ;;  %2121 = vst.msk [vmem:[%s3958_s12 + $0x4f8] sm:$0xff] %vm1961_vm1, %v1818_v10 }
 0x16f   : > { %2026 = vst.msk [vmem:[%s3958_s12 + $0x200] sm:$0xff] %vm1961_vm1, %v1343_v13  ;;  %2120 = vst.msk [vmem:[%s3958_s12 + $0x4f0] sm:$0xff] %vm1961_vm1, %v1813_v14  ;;  %v3130_v15 = vpop.f32.mrb[66].mxu0  ;;  %v3271_v16 = vpop.f32.mrb[66].mxu1 }
 0x170   : > { %v1358_v17 = vadd.f32 %v3130_v15, %v3952_v2  ;;  %v1828_v18 = vadd.f32 %v3271_v16, %v3952_v2  ;;  %v1352_v19 = vpop.f32.mrb[67].mxu0  ;;  %v1822_v20 = vpop.f32.mrb[67].mxu1 }
 0x171   : > { %v1353_v21 = vadd.f32 %v3952_v2, %v1352_v19  ;;  %v1823_v22 = vadd.f32 %v3952_v2, %v1822_v20 }
 0x172   : > { %2029 = vst.msk [vmem:[%s3958_s12 + $0x218] sm:$0xff] %vm1961_vm1, %v1358_v17  ;;  %2123 = vst.msk [vmem:[%s3958_s12 + $0x508] sm:$0xff] %vm1961_vm1, %v1828_v18 }
 0x173   : > { %2028 = vst.msk [vmem:[%s3958_s12 + $0x210] sm:$0xff] %vm1961_vm1, %v1353_v21  ;;  %2122 = vst.msk [vmem:[%s3958_s12 + $0x500] sm:$0xff] %vm1961_vm1, %v1823_v22  ;;  %v3133_v23 = vpop.f32.mrb[68].mxu0  ;;  %v3274_v24 = vpop.f32.mrb[68].mxu1 }
 0x174   : > { %v1368_v25 = vadd.f32 %v3133_v23, %v3952_v2  ;;  %v1838_v26 = vadd.f32 %v3274_v24, %v3952_v2  ;;  %v1362_v27 = vpop.f32.mrb[69].mxu0  ;;  %v1832_v28 = vpop.f32.mrb[69].mxu1 }
 0x175   : > { %v1363_v29 = vadd.f32 %v3952_v2, %v1362_v27  ;;  %v1833_v30 = vadd.f32 %v3952_v2, %v1832_v28 }
 0x176   : > { %2031 = vst.msk [vmem:[%s3958_s12 + $0x228] sm:$0xff] %vm1961_vm1, %v1368_v25  ;;  %2125 = vst.msk [vmem:[%s3958_s12 + $0x518] sm:$0xff] %vm1961_vm1, %v1838_v26 }
 0x177   : > { %2030 = vst.msk [vmem:[%s3958_s12 + $0x220] sm:$0xff] %vm1961_vm1, %v1363_v29  ;;  %2124 = vst.msk [vmem:[%s3958_s12 + $0x510] sm:$0xff] %vm1961_vm1, %v1833_v30  ;;  %v3136_v31 = vpop.f32.mrb[70].mxu0  ;;  %v3277_v32 = vpop.f32.mrb[70].mxu1  ;;  %v3412_v30 = vld [vmem:[%s4713_s2] ss:$0 sm:$0xff] }
 0x178   : > { %v1378_v33 = vadd.f32 %v3136_v31, %v3952_v2  ;;  %v1848_v34 = vadd.f32 %v3277_v32, %v3952_v2  ;;  %v1372_v35 = vpop.f32.mrb[71].mxu0  ;;  %v1842_v36 = vpop.f32.mrb[71].mxu1 }
 0x179   : > { %v1373_v37 = vadd.f32 %v3952_v2, %v1372_v35  ;;  %v1843_v38 = vadd.f32 %v3952_v2, %v1842_v36 }
 0x17a   : > { %2033 = vst.msk [vmem:[%s3958_s12 + $0x238] sm:$0xff] %vm1961_vm1, %v1378_v33  ;;  %2127 = vst.msk [vmem:[%s3958_s12 + $0x528] sm:$0xff] %vm1961_vm1, %v1848_v34 }
 0x17b   : > { %2032 = vst.msk [vmem:[%s3958_s12 + $0x230] sm:$0xff] %vm1961_vm1, %v1373_v37  ;;  %2126 = vst.msk [vmem:[%s3958_s12 + $0x520] sm:$0xff] %vm1961_vm1, %v1843_v38  ;;  %v3139_v39 = vpop.f32.mrb[72].mxu0  ;;  %v3280_v40 = vpop.f32.mrb[72].mxu1 }
 0x17c   : > { %v1388_v41 = vadd.f32 %v3139_v39, %v3952_v2  ;;  %v1858_v42 = vadd.f32 %v3280_v40, %v3952_v2  ;;  %v1382_v43 = vpop.f32.mrb[73].mxu0  ;;  %v1852_v44 = vpop.f32.mrb[73].mxu1 }
 0x17d   : > { %v1383_v45 = vadd.f32 %v3952_v2, %v1382_v43  ;;  %v1853_v46 = vadd.f32 %v3952_v2, %v1852_v44 }
 0x17e   : > { %2035 = vst.msk [vmem:[%s3958_s12 + $0x248] sm:$0xff] %vm1961_vm1, %v1388_v41  ;;  %2129 = vst.msk [vmem:[%s3958_s12 + $0x538] sm:$0xff] %vm1961_vm1, %v1858_v42 }
 0x17f   : > { %2034 = vst.msk [vmem:[%s3958_s12 + $0x240] sm:$0xff] %vm1961_vm1, %v1383_v45  ;;  %2128 = vst.msk [vmem:[%s3958_s12 + $0x530] sm:$0xff] %vm1961_vm1, %v1853_v46  ;;  %v3142_v47 = vpop.f32.mrb[74].mxu0  ;;  %v3283_v48 = vpop.f32.mrb[74].mxu1 }
 0x180   : > { %v1398_v49 = vadd.f32 %v3142_v47, %v3952_v2  ;;  %v1868_v50 = vadd.f32 %v3283_v48, %v3952_v2  ;;  %v1392_v51 = vpop.f32.mrb[75].mxu0  ;;  %v1862_v52 = vpop.f32.mrb[75].mxu1 }
 0x181   : > { %v1393_v53 = vadd.f32 %v3952_v2, %v1392_v51  ;;  %v1863_v54 = vadd.f32 %v3952_v2, %v1862_v52 }
 0x182   : > { %2037 = vst.msk [vmem:[%s3958_s12 + $0x258] sm:$0xff] %vm1961_vm1, %v1398_v49  ;;  %2131 = vst.msk [vmem:[%s3958_s12 + $0x548] sm:$0xff] %vm1961_vm1, %v1868_v50 }
 0x183   : > { %2036 = vst.msk [vmem:[%s3958_s12 + $0x250] sm:$0xff] %vm1961_vm1, %v1393_v53  ;;  %2130 = vst.msk [vmem:[%s3958_s12 + $0x540] sm:$0xff] %vm1961_vm1, %v1863_v54  ;;  %v3145_v55 = vpop.f32.mrb[76].mxu0  ;;  %v3286_v56 = vpop.f32.mrb[76].mxu1 }
 0x184   : > { %v1408_v57 = vadd.f32 %v3145_v55, %v3952_v2  ;;  %v1878_v58 = vadd.f32 %v3286_v56, %v3952_v2  ;;  %v1402_v59 = vpop.f32.mrb[77].mxu0  ;;  %v1872_v60 = vpop.f32.mrb[77].mxu1 }
 0x185   : > { %v1403_v61 = vadd.f32 %v3952_v2, %v1402_v59  ;;  %v1873_v62 = vadd.f32 %v3952_v2, %v1872_v60 }
 0x186   : > { %2039 = vst.msk [vmem:[%s3958_s12 + $0x268] sm:$0xff] %vm1961_vm1, %v1408_v57  ;;  %2133 = vst.msk [vmem:[%s3958_s12 + $0x558] sm:$0xff] %vm1961_vm1, %v1878_v58 }
 0x187   : > { %2038 = vst.msk [vmem:[%s3958_s12 + $0x260] sm:$0xff] %vm1961_vm1, %v1403_v61  ;;  %2132 = vst.msk [vmem:[%s3958_s12 + $0x550] sm:$0xff] %vm1961_vm1, %v1873_v62  ;;  %v3148_v63 = vpop.f32.mrb[78].mxu0  ;;  %v3289_v0 = vpop.f32.mrb[78].mxu1 }
 0x188   : > { %v1418_v1 = vadd.f32 %v3148_v63, %v3952_v2  ;;  %v1888_v3 = vadd.f32 %v3289_v0, %v3952_v2  ;;  %v1412_v4 = vpop.f32.mrb[79].mxu0  ;;  %v1882_v5 = vpop.f32.mrb[79].mxu1 }
 0x189   : > { %v1413_v6 = vadd.f32 %v3952_v2, %v1412_v4  ;;  %v1883_v7 = vadd.f32 %v3952_v2, %v1882_v5 }
 0x18a   : > { %2041 = vst.msk [vmem:[%s3958_s12 + $0x278] sm:$0xff] %vm1961_vm1, %v1418_v1  ;;  %2135 = vst.msk [vmem:[%s3958_s12 + $0x568] sm:$0xff] %vm1961_vm1, %v1888_v3 }
 0x18b   : > { %2040 = vst.msk [vmem:[%s3958_s12 + $0x270] sm:$0xff] %vm1961_vm1, %v1413_v6  ;;  %2134 = vst.msk [vmem:[%s3958_s12 + $0x560] sm:$0xff] %vm1961_vm1, %v1883_v7  ;;  %v3151_v8 = vpop.f32.mrb[80].mxu0  ;;  %v3292_v9 = vpop.f32.mrb[80].mxu1 }
 0x18c   : > { %v1428_v10 = vadd.f32 %v3151_v8, %v3952_v2  ;;  %v1898_v11 = vadd.f32 %v3292_v9, %v3952_v2  ;;  %v1422_v12 = vpop.f32.mrb[81].mxu0  ;;  %v1892_v13 = vpop.f32.mrb[81].mxu1 }
 0x18d   : > { %v1423_v14 = vadd.f32 %v3952_v2, %v1422_v12  ;;  %v1893_v15 = vadd.f32 %v3952_v2, %v1892_v13 }
 0x18e   : > { %2043 = vst.msk [vmem:[%s3958_s12 + $0x288] sm:$0xff] %vm1961_vm1, %v1428_v10  ;;  %2137 = vst.msk [vmem:[%s3958_s12 + $0x578] sm:$0xff] %vm1961_vm1, %v1898_v11 }
 0x18f   : > { %2042 = vst.msk [vmem:[%s3958_s12 + $0x280] sm:$0xff] %vm1961_vm1, %v1423_v14  ;;  %2136 = vst.msk [vmem:[%s3958_s12 + $0x570] sm:$0xff] %vm1961_vm1, %v1893_v15  ;;  %v3154_v16 = vpop.f32.mrb[82].mxu0  ;;  %v3295_v17 = vpop.f32.mrb[82].mxu1 }
 0x190   : > { %v1438_v18 = vadd.f32 %v3154_v16, %v3952_v2  ;;  %v1908_v19 = vadd.f32 %v3295_v17, %v3952_v2  ;;  %v1432_v20 = vpop.f32.mrb[83].mxu0  ;;  %v1902_v21 = vpop.f32.mrb[83].mxu1 }
 0x191   : > { %v1433_v22 = vadd.f32 %v3952_v2, %v1432_v20  ;;  %v1903_v23 = vadd.f32 %v3952_v2, %v1902_v21 }
 0x192   : > { %2045 = vst.msk [vmem:[%s3958_s12 + $0x298] sm:$0xff] %vm1961_vm1, %v1438_v18  ;;  %2139 = vst.msk [vmem:[%s3958_s12 + $0x588] sm:$0xff] %vm1961_vm1, %v1908_v19 }
 0x193   : > { %2044 = vst.msk [vmem:[%s3958_s12 + $0x290] sm:$0xff] %vm1961_vm1, %v1433_v22  ;;  %2138 = vst.msk [vmem:[%s3958_s12 + $0x580] sm:$0xff] %vm1961_vm1, %v1903_v23  ;;  %v3157_v24 = vpop.f32.mrb[84].mxu0  ;;  %v3298_v25 = vpop.f32.mrb[84].mxu1 }
 0x194   : > { %v1448_v26 = vadd.f32 %v3157_v24, %v3952_v2  ;;  %v1918_v27 = vadd.f32 %v3298_v25, %v3952_v2  ;;  %v1442_v28 = vpop.f32.mrb[85].mxu0  ;;  %v1912_v29 = vpop.f32.mrb[85].mxu1 }
 0x195   : > { %v1443_v31 = vadd.f32 %v3412_v30, %v1442_v28  ;;  %v1913_v32 = vadd.f32 %v3412_v30, %v1912_v29 }
 0x196   : > { %2047 = vst.msk [vmem:[%s3958_s12 + $0x2a8] sm:$0xff] %vm1961_vm1, %v1448_v26  ;;  %2141 = vst.msk [vmem:[%s3958_s12 + $0x598] sm:$0xff] %vm1961_vm1, %v1918_v27 }
 0x197   : > { %2046 = vst.msk [vmem:[%s3958_s12 + $0x2a0] sm:$0xff] %vm1961_vm1, %v1443_v31  ;;  %2140 = vst.msk [vmem:[%s3958_s12 + $0x590] sm:$0xff] %vm1961_vm1, %v1913_v32  ;;  %v3160_v2 = vpop.f32.mrb[86].mxu0  ;;  %v3301_v33 = vpop.f32.mrb[86].mxu1 }
 0x198   : > { %v1458_v34 = vadd.f32 %v3412_v30, %v3160_v2  ;;  %v1928_v35 = vadd.f32 %v3412_v30, %v3301_v33  ;;  %v1452_v36 = vpop.f32.mrb[87].mxu0  ;;  %v1922_v37 = vpop.f32.mrb[87].mxu1 }
 0x199   : > { %v1453_v38 = vadd.f32 %v3412_v30, %v1452_v36  ;;  %v1923_v39 = vadd.f32 %v3412_v30, %v1922_v37 }
 0x19a   : > { %2049 = vst.msk [vmem:[%s3958_s12 + $0x2b8] sm:$0xff] %vm1961_vm1, %v1458_v34  ;;  %2143 = vst.msk [vmem:[%s3958_s12 + $0x5a8] sm:$0xff] %vm1961_vm1, %v1928_v35 }
 0x19b   : > { %2048 = vst.msk [vmem:[%s3958_s12 + $0x2b0] sm:$0xff] %vm1961_vm1, %v1453_v38  ;;  %2142 = vst.msk [vmem:[%s3958_s12 + $0x5a0] sm:$0xff] %vm1961_vm1, %v1923_v39  ;;  %v3163_v40 = vpop.f32.mrb[88].mxu0  ;;  %v3304_v41 = vpop.f32.mrb[88].mxu1 }
 0x19c   : > { %v1468_v42 = vadd.f32 %v3412_v30, %v3163_v40  ;;  %v1938_v43 = vadd.f32 %v3412_v30, %v3304_v41  ;;  %v1462_v44 = vpop.f32.mrb[89].mxu0  ;;  %v1932_v45 = vpop.f32.mrb[89].mxu1 }
 0x19d   : > { %v1463_v46 = vadd.f32 %v3412_v30, %v1462_v44  ;;  %v1933_v47 = vadd.f32 %v3412_v30, %v1932_v45 }
 0x19e   : > { %2051 = vst.msk [vmem:[%s3958_s12 + $0x2c8] sm:$0xff] %vm1961_vm1, %v1468_v42  ;;  %2145 = vst.msk [vmem:[%s3958_s12 + $0x5b8] sm:$0xff] %vm1961_vm1, %v1938_v43 }
 0x19f   : > { %2050 = vst.msk [vmem:[%s3958_s12 + $0x2c0] sm:$0xff] %vm1961_vm1, %v1463_v46  ;;  %2144 = vst.msk [vmem:[%s3958_s12 + $0x5b0] sm:$0xff] %vm1961_vm1, %v1933_v47  ;;  %v3166_v48 = vpop.f32.mrb[90].mxu0  ;;  %v3307_v49 = vpop.f32.mrb[90].mxu1 }
 0x1a0   : > { %v1478_v50 = vadd.f32 %v3412_v30, %v3166_v48  ;;  %v1948_v51 = vadd.f32 %v3412_v30, %v3307_v49  ;;  %v1472_v52 = vpop.f32.mrb[91].mxu0  ;;  %v1942_v53 = vpop.f32.mrb[91].mxu1 }
 0x1a1   : > { %v1473_v54 = vadd.f32 %v3412_v30, %v1472_v52  ;;  %v1943_v55 = vadd.f32 %v3412_v30, %v1942_v53  ;;  %2156 = sbr.rel (!%p3546_p4) target bundleno = 496 (0x1f0), region = 36 }
 0x1a2   : > { %2053 = vst.msk [vmem:[%s3958_s12 + $0x2d8] sm:$0xff] %vm1961_vm1, %v1478_v50  ;;  %2147 = vst.msk [vmem:[%s3958_s12 + $0x5c8] sm:$0xff] %vm1961_vm1, %v1948_v51 }
 0x1a3   : > { %2052 = vst.msk [vmem:[%s3958_s12 + $0x2d0] sm:$0xff] %vm1961_vm1, %v1473_v54  ;;  %2146 = vst.msk [vmem:[%s3958_s12 + $0x5c0] sm:$0xff] %vm1961_vm1, %v1943_v55  ;;  %v3169_v56 = vpop.f32.mrb[92].mxu0  ;;  %v3310_v57 = vpop.f32.mrb[92].mxu1 }
 0x1a4   : > { %v1488_v58 = vadd.f32 %v3412_v30, %v3169_v56  ;;  %v1958_v59 = vadd.f32 %v3412_v30, %v3310_v57  ;;  %v1482_v60 = vpop.f32.mrb[93].mxu0  ;;  %v1952_v61 = vpop.f32.mrb[93].mxu1 }
 0x1a5   : > { %v1483_v62 = vadd.f32 %v3412_v30, %v1482_v60  ;;  %v1953_v63 = vadd.f32 %v3412_v30, %v1952_v61 }
 0x1a6   : > { %2055 = vst.msk [vmem:[%s3958_s12 + $0x2e8] sm:$0xff] %vm1961_vm1, %v1488_v58  ;;  %2149 = vst.msk [vmem:[%s3958_s12 + $0x5d8] sm:$0xff] %vm1961_vm1, %v1958_v59 }
 0x1a7   : > { %2054 = vst.msk [vmem:[%s3958_s12 + $0x2e0] sm:$0xff] %vm1961_vm1, %v1483_v62  ;;  %2148 = vst.msk [vmem:[%s3958_s12 + $0x5d0] sm:$0xff] %vm1961_vm1, %v1953_v63 }
 0x1a8   : > { %s4725_s18 = smov (!%p2159_p8, %s2158_s18), 188 }
 0x1a9   : > { %s2811_s25 = sshll.u32 %s4725_s18, 7 }
 0x1aa   : > { %p2814_p9 = scmp.eq.s32.totalorder %s2811_s25, 0 }
 0x1ab   : > { %s4518_s26 = sshrl.u32 (!%p2814_p9), %s4725_s18, 6 }
 0x1ac   : > { %2167 = sbr.rel (%p2814_p9) target bundleno = 496 (0x1f0), region = 40  ;;  %p2815_p10 = scmp.le.s32.totalorder (!%p2814_p9), %s4518_s26, 0 }
 0x1b3   : > { %2573 = sbr.rel (%p2815_p10) target bundleno = 475 (0x1db), region = 116  ;;  %s4716_s15 = smov (!%p2815_p10), %s4512_s24 }
 0x1b4   : > { %s4717_s20 = smov (!%p2815_p10), %s3958_s12  ;;  %s4527_s27 = smov (!%p2815_p10), 0  }
 0x1b5   : > { %s4529_s28 = smov (!%p2815_p10), 0  }
 0x1ba LB: >> { %v2355_v0 = vld [vmem:[%s3475_s20] sm:$0xff]  ;;  %v2357_v1 = vld [vmem:[%s3475_s20 + $0x8] sm:$0xff]  ;;  %v2359_v3 = vld [vmem:[%s3475_s20 + $0x10] sm:$0xff]  ;;  %s2483_s29 = sadd.s32 1, %s3479_s27  ;;  %s2349_s28 = sadd.s32 1, %s3483_s28   ;;  %s3483_s28 = sphi %s4529_s28, %s2349_s28   ;;  %s3479_s27 = sphi %s4527_s27, %s4720_s27   ;;  %s3475_s20 = sphi %s4717_s20, %s4719_s20   ;;  %s3471_s15 = sphi %s4716_s15, %s4718_s15  }
 0x1bb   : >> { %2356 = vst [vmem:[%s3471_s15] sm:$0xff] %v2355_v0  ;;  %2358 = vst [vmem:[%s3471_s15 + $0x8] sm:$0xff] %v2357_v1  ;;  %v2361_v4 = vld [vmem:[%s3475_s20 + $0x18] sm:$0xff]  ;;  %v2363_v5 = vld [vmem:[%s3475_s20 + $0x20] sm:$0xff]  ;;  %p2484_p11 = scmp.ge.s32.totalorder %s2483_s29, %s4518_s26  ;;  %p2348_p12 = scmp.ge.s32.totalorder %s2349_s28, %s4518_s26 }
 0x1bc   : >> { %2360 = vst [vmem:[%s3471_s15 + $0x10] sm:$0xff] %v2359_v3  ;;  %v2365_v6 = vld [vmem:[%s3475_s20 + $0x28] sm:$0xff]  ;;  %2362 = vst [vmem:[%s3471_s15 + $0x18] sm:$0xff] %v2361_v4  ;;  %v2367_v7 = vld [vmem:[%s3475_s20 + $0x30] sm:$0xff] }
 0x1bd   : >> { %2364 = vst [vmem:[%s3471_s15 + $0x20] sm:$0xff] %v2363_v5  ;;  %2366 = vst [vmem:[%s3471_s15 + $0x28] sm:$0xff] %v2365_v6  ;;  %v2369_v8 = vld [vmem:[%s3475_s20 + $0x38] sm:$0xff]  ;;  %v2371_v9 = vld [vmem:[%s3475_s20 + $0x40] sm:$0xff]  ;;  %s4727_s29 = smov (%p2484_p11, %s2483_s29), 0 }
 0x1be   : >> { %2368 = vst [vmem:[%s3471_s15 + $0x30] sm:$0xff] %v2367_v7  ;;  %2370 = vst [vmem:[%s3471_s15 + $0x38] sm:$0xff] %v2369_v8  ;;  %v2373_v10 = vld [vmem:[%s3475_s20 + $0x48] sm:$0xff]  ;;  %v2375_v11 = vld [vmem:[%s3475_s20 + $0x50] sm:$0xff]  ;;  %s2816_s30 = sshll.u32 %s4727_s29, 9  ;;  %s4720_s27 = smov %s4727_s29 }
 0x1bf   : >> { %2372 = vst [vmem:[%s3471_s15 + $0x40] sm:$0xff] %v2371_v9  ;;  %v2377_v12 = vld [vmem:[%s3475_s20 + $0x58] sm:$0xff]  ;;  %2374 = vst [vmem:[%s3471_s15 + $0x48] sm:$0xff] %v2373_v10  ;;  %v2379_v13 = vld [vmem:[%s3475_s20 + $0x60] sm:$0xff]  ;;  %s4585_s4 = scalar_lea.vmem %s3958_s12, %s2816_s30 [#allocation2]   ;;  %s4588_s5 = scalar_lea.vmem %s4512_s24, %s2816_s30  }
 0x1c0   : >> { %2376 = vst [vmem:[%s3471_s15 + $0x50] sm:$0xff] %v2375_v11  ;;  %2378 = vst [vmem:[%s3471_s15 + $0x58] sm:$0xff] %v2377_v12  ;;  %v2381_v14 = vld [vmem:[%s3475_s20 + $0x68] sm:$0xff]  ;;  %v2383_v15 = vld [vmem:[%s3475_s20 + $0x70] sm:$0xff] }
 0x1c1   : >> { %2380 = vst [vmem:[%s3471_s15 + $0x60] sm:$0xff] %v2379_v13  ;;  %2382 = vst [vmem:[%s3471_s15 + $0x68] sm:$0xff] %v2381_v14  ;;  %v2385_v16 = vld [vmem:[%s3475_s20 + $0x78] sm:$0xff]  ;;  %v2387_v17 = vld [vmem:[%s3475_s20 + $0x80] sm:$0xff] }
 0x1c2   : >> { %2384 = vst [vmem:[%s3471_s15 + $0x70] sm:$0xff] %v2383_v15  ;;  %v2389_v18 = vld [vmem:[%s3475_s20 + $0x88] sm:$0xff]  ;;  %2386 = vst [vmem:[%s3471_s15 + $0x78] sm:$0xff] %v2385_v16  ;;  %v2391_v19 = vld [vmem:[%s3475_s20 + $0x90] sm:$0xff] }
 0x1c3   : >> { %2388 = vst [vmem:[%s3471_s15 + $0x80] sm:$0xff] %v2387_v17  ;;  %2390 = vst [vmem:[%s3471_s15 + $0x88] sm:$0xff] %v2389_v18  ;;  %v2393_v20 = vld [vmem:[%s3475_s20 + $0x98] sm:$0xff]  ;;  %v2395_v21 = vld [vmem:[%s3475_s20 + $0xa0] sm:$0xff] }
 0x1c4   : >> { %2392 = vst [vmem:[%s3471_s15 + $0x90] sm:$0xff] %v2391_v19  ;;  %2394 = vst [vmem:[%s3471_s15 + $0x98] sm:$0xff] %v2393_v20  ;;  %v2397_v22 = vld [vmem:[%s3475_s20 + $0xa8] sm:$0xff]  ;;  %v2399_v23 = vld [vmem:[%s3475_s20 + $0xb0] sm:$0xff] }
 0x1c5   : >> { %2396 = vst [vmem:[%s3471_s15 + $0xa0] sm:$0xff] %v2395_v21  ;;  %v2401_v24 = vld [vmem:[%s3475_s20 + $0xb8] sm:$0xff]  ;;  %2398 = vst [vmem:[%s3471_s15 + $0xa8] sm:$0xff] %v2397_v22  ;;  %v2403_v25 = vld [vmem:[%s3475_s20 + $0xc0] sm:$0xff] }
 0x1c6   : >> { %2400 = vst [vmem:[%s3471_s15 + $0xb0] sm:$0xff] %v2399_v23  ;;  %2402 = vst [vmem:[%s3471_s15 + $0xb8] sm:$0xff] %v2401_v24  ;;  %v2405_v26 = vld [vmem:[%s3475_s20 + $0xc8] sm:$0xff]  ;;  %v2407_v27 = vld [vmem:[%s3475_s20 + $0xd0] sm:$0xff] }
 0x1c7   : >> { %2404 = vst [vmem:[%s3471_s15 + $0xc0] sm:$0xff] %v2403_v25  ;;  %2406 = vst [vmem:[%s3471_s15 + $0xc8] sm:$0xff] %v2405_v26  ;;  %v2409_v28 = vld [vmem:[%s3475_s20 + $0xd8] sm:$0xff]  ;;  %v2411_v29 = vld [vmem:[%s3475_s20 + $0xe0] sm:$0xff] }
 0x1c8   : >> { %2408 = vst [vmem:[%s3471_s15 + $0xd0] sm:$0xff] %v2407_v27  ;;  %v2413_v30 = vld [vmem:[%s3475_s20 + $0xe8] sm:$0xff]  ;;  %2410 = vst [vmem:[%s3471_s15 + $0xd8] sm:$0xff] %v2409_v28  ;;  %v2415_v31 = vld [vmem:[%s3475_s20 + $0xf0] sm:$0xff] }
 0x1c9   : >> { %2412 = vst [vmem:[%s3471_s15 + $0xe0] sm:$0xff] %v2411_v29  ;;  %2414 = vst [vmem:[%s3471_s15 + $0xe8] sm:$0xff] %v2413_v30  ;;  %v2417_v32 = vld [vmem:[%s3475_s20 + $0xf8] sm:$0xff]  ;;  %v2419_v2 = vld [vmem:[%s3475_s20 + $0x100] sm:$0xff] }
 0x1ca   : >> { %2416 = vst [vmem:[%s3471_s15 + $0xf0] sm:$0xff] %v2415_v31  ;;  %2418 = vst [vmem:[%s3471_s15 + $0xf8] sm:$0xff] %v2417_v32  ;;  %v2421_v33 = vld [vmem:[%s3475_s20 + $0x108] sm:$0xff]  ;;  %v2423_v34 = vld [vmem:[%s3475_s20 + $0x110] sm:$0xff] }
 0x1cb   : >> { %2420 = vst [vmem:[%s3471_s15 + $0x100] sm:$0xff] %v2419_v2  ;;  %v2425_v35 = vld [vmem:[%s3475_s20 + $0x118] sm:$0xff]  ;;  %2422 = vst [vmem:[%s3471_s15 + $0x108] sm:$0xff] %v2421_v33  ;;  %v2427_v36 = vld [vmem:[%s3475_s20 + $0x120] sm:$0xff] }
 0x1cc   : >> { %2424 = vst [vmem:[%s3471_s15 + $0x110] sm:$0xff] %v2423_v34  ;;  %2426 = vst [vmem:[%s3471_s15 + $0x118] sm:$0xff] %v2425_v35  ;;  %v2429_v37 = vld [vmem:[%s3475_s20 + $0x128] sm:$0xff]  ;;  %v2431_v38 = vld [vmem:[%s3475_s20 + $0x130] sm:$0xff] }
 0x1cd   : >> { %2428 = vst [vmem:[%s3471_s15 + $0x120] sm:$0xff] %v2427_v36  ;;  %2430 = vst [vmem:[%s3471_s15 + $0x128] sm:$0xff] %v2429_v37  ;;  %v2433_v39 = vld [vmem:[%s3475_s20 + $0x138] sm:$0xff]  ;;  %v2435_v40 = vld [vmem:[%s3475_s20 + $0x140] sm:$0xff] }
 0x1ce   : >> { %2432 = vst [vmem:[%s3471_s15 + $0x130] sm:$0xff] %v2431_v38  ;;  %v2437_v41 = vld [vmem:[%s3475_s20 + $0x148] sm:$0xff]  ;;  %2434 = vst [vmem:[%s3471_s15 + $0x138] sm:$0xff] %v2433_v39  ;;  %v2439_v42 = vld [vmem:[%s3475_s20 + $0x150] sm:$0xff] }
 0x1cf   : >> { %2436 = vst [vmem:[%s3471_s15 + $0x140] sm:$0xff] %v2435_v40  ;;  %2438 = vst [vmem:[%s3471_s15 + $0x148] sm:$0xff] %v2437_v41  ;;  %v2441_v43 = vld [vmem:[%s3475_s20 + $0x158] sm:$0xff]  ;;  %v2443_v44 = vld [vmem:[%s3475_s20 + $0x160] sm:$0xff] }
 0x1d0   : >> { %2440 = vst [vmem:[%s3471_s15 + $0x150] sm:$0xff] %v2439_v42  ;;  %2442 = vst [vmem:[%s3471_s15 + $0x158] sm:$0xff] %v2441_v43  ;;  %v2445_v45 = vld [vmem:[%s3475_s20 + $0x168] sm:$0xff]  ;;  %v2447_v46 = vld [vmem:[%s3475_s20 + $0x170] sm:$0xff] }
 0x1d1   : >> { %2444 = vst [vmem:[%s3471_s15 + $0x160] sm:$0xff] %v2443_v44  ;;  %v2449_v47 = vld [vmem:[%s3475_s20 + $0x178] sm:$0xff]  ;;  %2446 = vst [vmem:[%s3471_s15 + $0x168] sm:$0xff] %v2445_v45  ;;  %v2451_v48 = vld [vmem:[%s3475_s20 + $0x180] sm:$0xff] }
 0x1d2   : >> { %2448 = vst [vmem:[%s3471_s15 + $0x170] sm:$0xff] %v2447_v46  ;;  %2450 = vst [vmem:[%s3471_s15 + $0x178] sm:$0xff] %v2449_v47  ;;  %v2453_v49 = vld [vmem:[%s3475_s20 + $0x188] sm:$0xff]  ;;  %v2455_v50 = vld [vmem:[%s3475_s20 + $0x190] sm:$0xff] }
 0x1d3   : >> { %2452 = vst [vmem:[%s3471_s15 + $0x180] sm:$0xff] %v2451_v48  ;;  %2454 = vst [vmem:[%s3471_s15 + $0x188] sm:$0xff] %v2453_v49  ;;  %v2457_v51 = vld [vmem:[%s3475_s20 + $0x198] sm:$0xff]  ;;  %v2459_v52 = vld [vmem:[%s3475_s20 + $0x1a0] sm:$0xff] }
 0x1d4   : >> { %2456 = vst [vmem:[%s3471_s15 + $0x190] sm:$0xff] %v2455_v50  ;;  %v2461_v53 = vld [vmem:[%s3475_s20 + $0x1a8] sm:$0xff]  ;;  %2458 = vst [vmem:[%s3471_s15 + $0x198] sm:$0xff] %v2457_v51  ;;  %v2463_v54 = vld [vmem:[%s3475_s20 + $0x1b0] sm:$0xff]  ;;  %2351 = sbr.rel (!%p2348_p12) target bundleno = 442 (0x1ba), region = 122 }
 0x1d5   : >> { %2460 = vst [vmem:[%s3471_s15 + $0x1a0] sm:$0xff] %v2459_v52  ;;  %2462 = vst [vmem:[%s3471_s15 + $0x1a8] sm:$0xff] %v2461_v53  ;;  %v2465_v55 = vld [vmem:[%s3475_s20 + $0x1b8] sm:$0xff]  ;;  %v2467_v56 = vld [vmem:[%s3475_s20 + $0x1c0] sm:$0xff] }
 0x1d6   : >> { %2464 = vst [vmem:[%s3471_s15 + $0x1b0] sm:$0xff] %v2463_v54  ;;  %2466 = vst [vmem:[%s3471_s15 + $0x1b8] sm:$0xff] %v2465_v55  ;;  %v2469_v57 = vld [vmem:[%s3475_s20 + $0x1c8] sm:$0xff]  ;;  %v2471_v58 = vld [vmem:[%s3475_s20 + $0x1d0] sm:$0xff] }
 0x1d7   : >> { %2468 = vst [vmem:[%s3471_s15 + $0x1c0] sm:$0xff] %v2467_v56  ;;  %v2473_v59 = vld [vmem:[%s3475_s20 + $0x1d8] sm:$0xff]  ;;  %2470 = vst [vmem:[%s3471_s15 + $0x1c8] sm:$0xff] %v2469_v57  ;;  %v2475_v60 = vld [vmem:[%s3475_s20 + $0x1e0] sm:$0xff] }
 0x1d8   : >> { %2472 = vst [vmem:[%s3471_s15 + $0x1d0] sm:$0xff] %v2471_v58  ;;  %2474 = vst [vmem:[%s3471_s15 + $0x1d8] sm:$0xff] %v2473_v59  ;;  %v2477_v61 = vld [vmem:[%s3475_s20 + $0x1e8] sm:$0xff]  ;;  %v2479_v62 = vld [vmem:[%s3475_s20 + $0x1f0] sm:$0xff] }
 0x1d9   : >> { %2476 = vst [vmem:[%s3471_s15 + $0x1e0] sm:$0xff] %v2475_v60  ;;  %2478 = vst [vmem:[%s3471_s15 + $0x1e8] sm:$0xff] %v2477_v61  ;;  %v2481_v63 = vld [vmem:[%s3475_s20 + $0x1f8] sm:$0xff]  ;;  %s4719_s20 = smov %s4585_s4 }
 0x1da   : >> { %2480 = vst [vmem:[%s3471_s15 + $0x1f0] sm:$0xff] %v2479_v62  ;;  %2482 = vst [vmem:[%s3471_s15 + $0x1f8] sm:$0xff] %v2481_v63  ;;  %s4718_s15 = smov %s4588_s5 }
 0x1db PF: > { %s4693_s6 = sand.u32 63, %s4725_s18   ;;  %s2827_s7 = sshll.u32 %s4518_s26, 9 }
 0x1dc   : > { %s2494_s8 = scalar_lea.vmem %s3958_s12, %s2827_s7 [#allocation2]   ;;  %s2496_s9 = scalar_lea.vmem %s4512_s24, %s2827_s7  }
 0x1dd   : > { %p2821_p13 = scmp.le.s32.totalorder %s4693_s6, 0 }
 0x1de   : > { %s3485_s10 = smov (!%p2821_p13), %s2496_s9   ;;  %s3489_s11 = smov (!%p2821_p13), %s2494_s8  }
 0x1df   : > { %2587 = sbr.rel (%p2821_p13) target bundleno = 496 (0x1f0), region = 127  ;;  %s3493_s14 = smov (!%p2821_p13), 0  }
 0x1e0   : > { %s3497_s17 = smov (!%p2821_p13), 0  }
 0x1e6 LB: >> { %v2506_v0 = vld [vmem:[%s3491_s11] sm:$0xff]  ;;  %s2508_s18 = sadd.s32 1, %s3495_s14  ;;  %s2500_s17 = sadd.s32 1, %s3499_s17   ;;  %s3499_s17 = sphi %s3497_s17, %s2500_s17   ;;  %s3495_s14 = sphi %s3493_s14, %s3494_s14   ;;  %s3491_s11 = sphi %s3489_s11, %s2513_s11   ;;  %s3487_s10 = sphi %s3485_s10, %s2514_s10  }
 0x1e7   : >> { %2507 = vst [vmem:[%s3487_s10] sm:$0xff] %v2506_v0  ;;  %p2509_p0 = scmp.ge.s32.totalorder %s2508_s18, %s4693_s6  ;;  %p2499_p1 = scmp.ge.s32.totalorder %s2500_s17, %s4693_s6 }
 0x1e9   : >> { %s4729_s18 = smov (%p2509_p0, %s2508_s18), 0  ;;  %2502 = sbr.rel (!%p2499_p1) target bundleno = 486 (0x1e6), region = 133 }
 0x1ea   : >> { %s2822_s12 = sshll.u32 %s4729_s18, 3  ;;  %s3494_s14 = smov %s4729_s18  }
 0x1eb   : >> { %s2513_s11 = scalar_lea.vmem %s2494_s8, %s2822_s12 [#allocation2]   ;;  %s2514_s10 = scalar_lea.vmem %s2496_s9, %s2822_s12  }
 0x1f0 PF: > { %p10_p2 = scmp.ge.s32.totalorder %s3536_s16, 4   ;;  %s4721_s12 = smov %s3463_s13 }
 0x1f1   : > { %s4722_s13 = smov %s3544_s19  ;;  %s4723_s14 = smov %s3536_s16 }
 0x1f2   :  { %12 = sbr.rel (!%p10_p2) target bundleno = 2 (0x2), region = 144 }

</bundles_post_ra>
